<compile_context>
chip_gen: v7x
topology: tpu7x:2x2x1
jax: 0.10.0
libtpu: 0.0.40
codegen_flags: <defaults>
</compile_context>

<pallas_src>
import jax
import jax.numpy as jnp
from jax.experimental import pallas as pl
from jax.experimental.pallas import tpu as pltpu


def mlp_kernel(x_ref, w1_ref, b1_ref, w2_ref, b2_ref, o_ref):
    # Layer 1: (tile_n, d_in) @ (d_in, hidden) -> (tile_n, hidden), f32 acc.
    h = jnp.dot(x_ref[...], w1_ref[...], preferred_element_type=jnp.float32)
    h = h + b1_ref[...]                 # (1, hidden) broadcasts over rows
    h = jnp.maximum(h, 0.0)             # ReLU; dropout p=0.0 -> identity
    # Layer 2 (plain_last -> no activation); intermediate stays in f32.
    y = jnp.dot(h, w2_ref[...].astype(jnp.float32),
                preferred_element_type=jnp.float32)
    y = y + b2_ref[...]                 # (1, d_out) broadcasts over rows
    o_ref[...] = y.astype(o_ref.dtype)


def mlp_forward(x, w1, b1, w2, b2, *, tile_n=None):
    """x: (N, d_in); w1: (d_in, hidden); b1: (hidden,); w2: (hidden, d_out); b2: (d_out,)."""
    n, d_in = x.shape
    hidden = w1.shape[1]
    d_out = w2.shape[1]

    if tile_n is None:
        # Aim for >=2 grid steps (keeps both v7x TensorCores busy), but cap
        # the tile so the double-buffered working set stays small everywhere.
        half = -(-n // 2)
        tile_n = max(128, min(4096, ((half + 127) // 128) * 128))
    if tile_n >= n:
        tile_n = n                      # single full-extent block
    else:
        tile_n = max(8, (tile_n // 8) * 8)   # sublane-aligned tile

    b1r = b1.reshape(1, hidden)
    b2r = b2.reshape(1, d_out)

    grid = (pl.cdiv(n, tile_n),)

    bytes_per_elt = jnp.dtype(x.dtype).itemsize
    cost = pl.CostEstimate(
        flops=2 * n * (d_in * hidden + hidden * d_out),
        transcendentals=0,
        bytes_accessed=n * (d_in + d_out) * bytes_per_elt
        + 4 * (w1.size + b1.size + w2.size + b2.size),
    )

    return pl.pallas_call(
        mlp_kernel,
        out_shape=jax.ShapeDtypeStruct((n, d_out), x.dtype),
        grid_spec=pl.GridSpec(
            grid=grid,
            in_specs=[
                # x tiles march along the row (batch) axis; minor dim is full.
                pl.BlockSpec((tile_n, d_in), lambda i: (i, 0)),
                # Weights / biases: constant index_map -> VMEM-resident.
                pl.BlockSpec((d_in, hidden), lambda i: (0, 0)),
                pl.BlockSpec((1, hidden), lambda i: (0, 0)),
                pl.BlockSpec((hidden, d_out), lambda i: (0, 0)),
                pl.BlockSpec((1, d_out), lambda i: (0, 0)),
            ],
            out_specs=pl.BlockSpec((tile_n, d_out), lambda i: (i, 0)),
        ),
        compiler_params=pltpu.CompilerParams(
            dimension_semantics=("parallel",)),
        cost_estimate=cost,
    )(x, w1, b1r, w2, b2r)


def reference_mlp(x, w1, b1, w2, b2):
    h = jnp.maximum(x @ w1 + b1, 0.0)
    return h @ w2 + b2


if __name__ == "__main__":
    # Shapes consistent with the module defaults: hidden_dim=16, output_dim=8,
    # LazyLinear-inferred input features = 32.  N=2048 rows -> 2 grid steps
    # with the default tile, exercising the pipelined / megacore path.
    N, D_IN, HIDDEN, D_OUT = 2048, 32, 16, 8

    key = jax.random.PRNGKey(0)
    kx, kw1, kb1, kw2, kb2 = jax.random.split(key, 5)

    x = jax.random.normal(kx, (N, D_IN), dtype=jnp.float32)

    # Deterministic parameter init (Kaiming-uniform-like bounds, like nn.Linear).
    lim1 = 1.0 / jnp.sqrt(D_IN)
    w1 = jax.random.uniform(kw1, (D_IN, HIDDEN), jnp.float32, -lim1, lim1)
    b1 = jax.random.uniform(kb1, (HIDDEN,), jnp.float32, -lim1, lim1)
    lim2 = 1.0 / jnp.sqrt(HIDDEN)
    w2 = jax.random.uniform(kw2, (HIDDEN, D_OUT), jnp.float32, -lim2, lim2)
    b2 = jax.random.uniform(kb2, (D_OUT,), jnp.float32, -lim2, lim2)

    out = mlp_forward(x, w1, b1, w2, b2)
    out = jax.block_until_ready(out)

    ref = reference_mlp(x, w1, b1, w2, b2)
    assert out.shape == (N, D_OUT), out.shape
    assert jnp.allclose(out, ref, atol=1e-4, rtol=1e-4), "mismatch vs reference"

    print("KERNEL_OK")
</pallas_src>

<mosaic_0001>
module attributes {stable_mosaic.version = 11 : i64} {
  func.func @mlp_kernel(%arg0: i32, %arg1: memref<1024x32xf32, #tpu.memory_space<vmem>>, %arg2: memref<32x16xf32, #tpu.memory_space<vmem>>, %arg3: memref<1x16xf32, #tpu.memory_space<vmem>>, %arg4: memref<16x8xf32, #tpu.memory_space<vmem>>, %arg5: memref<1x8xf32, #tpu.memory_space<vmem>>, %arg6: memref<1024x8xf32, #tpu.memory_space<vmem>>) attributes {dimension_semantics = [#tpu.dimension_semantics<parallel>], iteration_bounds = array<i64: 2>, scalar_prefetch = 0 : i64, scratch_operands = 0 : i64, tpu.core_type = #tpu.core_type<tc>, window_params = [{transform_indices = @transform_0, window_bounds = array<i64: 1024, 32>}, {pipeline_mode = #tpu.pipeline_mode<synchronous>, transform_indices = @transform_1, window_bounds = array<i64: 32, 16>}, {pipeline_mode = #tpu.pipeline_mode<synchronous>, transform_indices = @transform_2, window_bounds = array<i64: 1, 16>}, {pipeline_mode = #tpu.pipeline_mode<synchronous>, transform_indices = @transform_3, window_bounds = array<i64: 16, 8>}, {pipeline_mode = #tpu.pipeline_mode<synchronous>, transform_indices = @transform_4, window_bounds = array<i64: 1, 8>}, {transform_indices = @transform_5, window_bounds = array<i64: 1024, 8>}]} {
    %c0 = arith.constant 0 : index
    %c0_0 = arith.constant 0 : index
    %0 = vector.load %arg1[%c0, %c0_0] : memref<1024x32xf32, #tpu.memory_space<vmem>>, vector<1024x32xf32>
    %c0_1 = arith.constant 0 : index
    %c0_2 = arith.constant 0 : index
    %1 = vector.load %arg2[%c0_1, %c0_2] : memref<32x16xf32, #tpu.memory_space<vmem>>, vector<32x16xf32>
    %cst = arith.constant dense<0.000000e+00> : vector<1024x16xf32>
    %2 = tpu.matmul %0, %1, %cst {dimension_numbers = #tpu.dot_dimension_numbers<[1], [0], [0], [1], [0, 0, 1, 1], [], []>} : vector<1024x32xf32>, vector<32x16xf32>, vector<1024x16xf32> -> vector<1024x16xf32>
    %c0_3 = arith.constant 0 : index
    %c0_4 = arith.constant 0 : index
    %3 = vector.load %arg3[%c0_3, %c0_4] : memref<1x16xf32, #tpu.memory_space<vmem>>, vector<1x16xf32>
    %4 = vector.broadcast %3 : vector<1x16xf32> to vector<1024x16xf32>
    %5 = arith.addf %2, %4 : vector<1024x16xf32>
    %cst_5 = arith.constant 0.000000e+00 : f32
    %6 = vector.broadcast %cst_5 : f32 to vector<1024x16xf32>
    %7 = arith.maximumf %5, %6 : vector<1024x16xf32>
    %c0_6 = arith.constant 0 : index
    %c0_7 = arith.constant 0 : index
    %8 = vector.load %arg4[%c0_6, %c0_7] : memref<16x8xf32, #tpu.memory_space<vmem>>, vector<16x8xf32>
    %cst_8 = arith.constant dense<0.000000e+00> : vector<1024x8xf32>
    %9 = tpu.matmul %7, %8, %cst_8 {dimension_numbers = #tpu.dot_dimension_numbers<[1], [0], [0], [1], [0, 0, 1, 1], [], []>} : vector<1024x16xf32>, vector<16x8xf32>, vector<1024x8xf32> -> vector<1024x8xf32>
    %c0_9 = arith.constant 0 : index
    %c0_10 = arith.constant 0 : index
    %10 = vector.load %arg5[%c0_9, %c0_10] : memref<1x8xf32, #tpu.memory_space<vmem>>, vector<1x8xf32>
    %11 = vector.broadcast %10 : vector<1x8xf32> to vector<1024x8xf32>
    %12 = arith.addf %9, %11 : vector<1024x8xf32>
    %c0_11 = arith.constant 0 : index
    %c0_12 = arith.constant 0 : index
    %13 = vector.load %arg6[%c0_11, %c0_12] : memref<1024x8xf32, #tpu.memory_space<vmem>>, vector<1024x8xf32>
    tpu.vector_store %arg6[%c0_11, %c0_12], %12 {strides = array<i32>} : memref<1024x8xf32, #tpu.memory_space<vmem>>, vector<1024x8xf32>,
    return
  }
  func.func @transform_0(%arg0: i32) -> (i32, i32) {
    %c0_i32 = arith.constant 0 : i32
    %c0_i32_0 = arith.constant 0 : i32
    return %arg0, %c0_i32 : i32, i32
  }
  func.func @transform_1(%arg0: i32) -> (i32, i32) {
    %c0_i32 = arith.constant 0 : i32
    %c0_i32_0 = arith.constant 0 : i32
    %c0_i32_1 = arith.constant 0 : i32
    return %c0_i32, %c0_i32_0 : i32, i32
  }
  func.func @transform_2(%arg0: i32) -> (i32, i32) {
    %c0_i32 = arith.constant 0 : i32
    %c0_i32_0 = arith.constant 0 : i32
    %c0_i32_1 = arith.constant 0 : i32
    return %c0_i32, %c0_i32_0 : i32, i32
  }
  func.func @transform_3(%arg0: i32) -> (i32, i32) {
    %c0_i32 = arith.constant 0 : i32
    %c0_i32_0 = arith.constant 0 : i32
    %c0_i32_1 = arith.constant 0 : i32
    return %c0_i32, %c0_i32_0 : i32, i32
  }
  func.func @transform_4(%arg0: i32) -> (i32, i32) {
    %c0_i32 = arith.constant 0 : i32
    %c0_i32_0 = arith.constant 0 : i32
    %c0_i32_1 = arith.constant 0 : i32
    return %c0_i32, %c0_i32_0 : i32, i32
  }
  func.func @transform_5(%arg0: i32) -> (i32, i32) {
    %c0_i32 = arith.constant 0 : i32
    %c0_i32_0 = arith.constant 0 : i32
    return %arg0, %c0_i32 : i32, i32
  }
}

</mosaic_0001>

<bundles_post_ra>
// kernel: tpu_custom_call.1
= control target key start
LH: loop header
LB: loop body
LE: loop exit
PB: predicated region body
PF: predicated region fallthrough
CT: control target
= control target key end

     0   :  { %s3855_s18 = smov 0   ;;  %s4812_s0 = inlined_call_operand.vmem [shape: f32[2048,32], index: 0, kind: input, shape index: {}]   ;;  %s4813_s1 = inlined_call_operand.vmem [shape: f32[32,16], index: 1, kind: input, shape index: {}]   ;;  %s4814_s2 = inlined_call_operand.vmem [shape: f32[1,16], index: 2, kind: input, shape index: {}]   ;;  %s4815_s3 = inlined_call_operand.vmem [shape: f32[16,8], index: 3, kind: input, shape index: {}]   ;;  %s4816_s4 = inlined_call_operand.vmem [shape: f32[1,8], index: 4, kind: input, shape index: {}]   ;;  %s4817_s5 = inlined_call_operand.vmem [shape: f32[2048,8], index: 5, kind: output, shape index: {}]  }
   0x1 LB: > { %s2869_s19 = sadd.s32 4294967295, %s3823_s18   ;;  %p2873_p0 = scmp.ge.s32.totalorder %s3823_s18, 1  ;;  %s3823_s18 = sphi %s3855_s18, %s15_s18  }
   0x2   : > { %p188_p1 = scmp.lt.s32.totalorder %s3823_s18, 3 }
   0x4   : > { %p189_p2 = pnand %p2873_p0, %p188_p1 }
   0x5   : > { %v356_v0 = vld [vmem:[%s4813_s1] sm:$0xff] (!%p189_p2)  ;;  %v357_v1 = vld [vmem:[%s4813_s1 + $0x8] sm:$0xff] (!%p189_p2)  ;;  %v358_v2 = vld [vmem:[%s4813_s1 + $0x10] sm:$0xff] (!%p189_p2)  ;;  %s2874_s26 = sshll.u32 (!%p189_p2), %s2869_s19, 7  ;;  %vm367_vm0 = vcmask (!%p189_p2), 261120   ;;  %vm1594_vm1 = vcmask (!%p189_p2), 130048  }
   0x6   : > { %192 = sbr.rel (%p189_p2) target bundleno = 704 (0x2c0), region = 40  ;;  %v3796_v3 = vpack.c.bf16 (!%p189_p2), %v357_v1, %v356_v0  ;;  %v359_v4 = vld [vmem:[%s4813_s1 + $0x18] sm:$0xff] (!%p189_p2)  ;;  %p217_p3 = scmp.lt.s32.totalorder (!%p189_p2), %s2874_s26, 255  ;;  %v1585_v51 = vld [vmem:[%s4815_s3] sm:$0xff] (!%p189_p2)  ;;  %v1586_v52 = vld [vmem:[%s4815_s3 + $0x8] sm:$0xff] (!%p189_p2)  ;;  %vm2684_vm2 = vcmask (!%p189_p2), 64512  }
   0x7   : > { %v3800_v5 = vpack.c.bf16 (!%p189_p2), %v359_v4, %v358_v2  ;;  %v3804_v54 = vpack.c.bf16 (!%p189_p2), %v1586_v52, %v1585_v51  ;;  %v4107_v52 = vld [vmem:[%s4814_s2] ss:$0 sm:$0xff] (!%p189_p2) }
   0x8   : > { %3797 = vmatprep.subr.bf16.mxu0 (!%p189_p2), %v3796_v3 }
   0x9   : > { %3799 = vmatpush3.bf16.msra.mxu0 (!%p189_p2), %v3796_v3  ;;  %3805 = vmatprep.subr.bf16.mxu1 (!%p189_p2), %v3804_v54 }
   0xa   : > { %3801 = vmatprep.subr.bf16.mxu0 (!%p189_p2), %v3800_v5  ;;  %3807 = vmatpush3.bf16.msra.mxu1 (!%p189_p2), %v3804_v54 }
   0xd   : > { %s4819_s26 = smov (!%p217_p3, %s2874_s26), 255  ;;  %3803 = vmatpush3.bf16.msra.mxu0 %v3800_v5 }
   0xe   : > { %s2875_s29 = sshll.u32 %s4819_s26, 3 }
   0xf   : > { %s3883_s7 = scalar_lea.vmem %s4812_s0, %s2875_s29  ;;  %s4377_s19 = scalar_lea.vmem %s4817_s5, %s2875_s29 }
  0x10   : > { %v228_v6 = vld [vmem:[%s3883_s7] sm:$0xff]  ;;  %v229_v7 = vld [vmem:[%s3883_s7 + $0x8] sm:$0xff]  ;;  %v230_v8 = vld [vmem:[%s3883_s7 + $0x10] sm:$0xff] }
  0x11   : > { %3408 = vmatprep.mubr.msk.f32.mxu0 %vm367_vm0, %v228_v6  ;;  %v231_v9 = vld [vmem:[%s3883_s7 + $0x18] sm:$0xff]  ;;  %v232_v10 = vld [vmem:[%s3883_s7 + $0x20] sm:$0xff]  ;;  %v233_v11 = vld [vmem:[%s3883_s7 + $0x28] sm:$0xff] }
  0x12   : > { %3409 = vmatmul.mubr.msk.f32.vlgmr.msra.gmra.mrb[0].mxu0 %vm367_vm0, %v229_v7  ;;  %v234_v12 = vld [vmem:[%s3883_s7 + $0x30] sm:$0xff]  ;;  %v235_v13 = vld [vmem:[%s3883_s7 + $0x38] sm:$0xff]  ;;  %v236_v14 = vld [vmem:[%s3883_s7 + $0x40] sm:$0xff] }
  0x13   : > { %3411 = vmatprep.mubr.msk.f32.mxu0 %vm367_vm0, %v230_v8  ;;  %v237_v15 = vld [vmem:[%s3883_s7 + $0x48] sm:$0xff]  ;;  %v238_v16 = vld [vmem:[%s3883_s7 + $0x50] sm:$0xff]  ;;  %v239_v17 = vld [vmem:[%s3883_s7 + $0x58] sm:$0xff] }
  0x14   : > { %v240_v18 = vld [vmem:[%s3883_s7 + $0x60] sm:$0xff]  ;;  %v241_v19 = vld [vmem:[%s3883_s7 + $0x68] sm:$0xff]  ;;  %v242_v20 = vld [vmem:[%s3883_s7 + $0x70] sm:$0xff] }
  0x15   : > { %v243_v21 = vld [vmem:[%s3883_s7 + $0x78] sm:$0xff]  ;;  %v244_v22 = vld [vmem:[%s3883_s7 + $0x80] sm:$0xff]  ;;  %v245_v23 = vld [vmem:[%s3883_s7 + $0x88] sm:$0xff] }
  0x16   : > { %3412 = vmatmul.mubr.msk.f32.gmra.mrb[2].mxu0 %vm367_vm0, %v231_v9  ;;  %v246_v24 = vld [vmem:[%s3883_s7 + $0x90] sm:$0xff]  ;;  %v247_v25 = vld [vmem:[%s3883_s7 + $0x98] sm:$0xff]  ;;  %v248_v26 = vld [vmem:[%s3883_s7 + $0xa0] sm:$0xff] }
  0x17   : > { %3414 = vmatprep.mubr.msk.f32.mxu0 %vm367_vm0, %v232_v10  ;;  %v249_v27 = vld [vmem:[%s3883_s7 + $0xa8] sm:$0xff]  ;;  %v250_v28 = vld [vmem:[%s3883_s7 + $0xb0] sm:$0xff]  ;;  %v251_v29 = vld [vmem:[%s3883_s7 + $0xb8] sm:$0xff] }
  0x18   : > { %v252_v30 = vld [vmem:[%s3883_s7 + $0xc0] sm:$0xff]  ;;  %v253_v31 = vld [vmem:[%s3883_s7 + $0xc8] sm:$0xff]  ;;  %v254_v32 = vld [vmem:[%s3883_s7 + $0xd0] sm:$0xff] }
  0x19   : > { %v255_v33 = vld [vmem:[%s3883_s7 + $0xd8] sm:$0xff]  ;;  %v256_v34 = vld [vmem:[%s3883_s7 + $0xe0] sm:$0xff]  ;;  %v257_v35 = vld [vmem:[%s3883_s7 + $0xe8] sm:$0xff] }
  0x1a   : > { %3415 = vmatmul.mubr.msk.f32.gmra.mrb[4].mxu0 %vm367_vm0, %v233_v11  ;;  %v258_v36 = vld [vmem:[%s3883_s7 + $0xf0] sm:$0xff]  ;;  %v259_v37 = vld [vmem:[%s3883_s7 + $0xf8] sm:$0xff]  ;;  %v260_v38 = vld [vmem:[%s3883_s7 + $0x100] sm:$0xff] }
  0x1b   : > { %3417 = vmatprep.mubr.msk.f32.mxu0 %vm367_vm0, %v234_v12  ;;  %v261_v39 = vld [vmem:[%s3883_s7 + $0x108] sm:$0xff]  ;;  %v262_v40 = vld [vmem:[%s3883_s7 + $0x110] sm:$0xff]  ;;  %v263_v41 = vld [vmem:[%s3883_s7 + $0x118] sm:$0xff] }
  0x1c   : > { %v264_v42 = vld [vmem:[%s3883_s7 + $0x120] sm:$0xff]  ;;  %v265_v43 = vld [vmem:[%s3883_s7 + $0x128] sm:$0xff]  ;;  %v266_v44 = vld [vmem:[%s3883_s7 + $0x130] sm:$0xff] }
  0x1d   : > { %v267_v45 = vld [vmem:[%s3883_s7 + $0x138] sm:$0xff]  ;;  %v268_v46 = vld [vmem:[%s3883_s7 + $0x140] sm:$0xff]  ;;  %v269_v47 = vld [vmem:[%s3883_s7 + $0x148] sm:$0xff] }
  0x1e   : > { %3418 = vmatmul.mubr.msk.f32.gmra.mrb[6].mxu0 %vm367_vm0, %v235_v13  ;;  %v270_v48 = vld [vmem:[%s3883_s7 + $0x150] sm:$0xff]  ;;  %v271_v49 = vld [vmem:[%s3883_s7 + $0x158] sm:$0xff]  ;;  %v272_v50 = vld [vmem:[%s3883_s7 + $0x160] sm:$0xff] }
  0x1f   : > { %3420 = vmatprep.mubr.msk.f32.mxu0 %vm367_vm0, %v236_v14  ;;  %v273_v53 = vld [vmem:[%s3883_s7 + $0x168] sm:$0xff]  ;;  %v274_v55 = vld [vmem:[%s3883_s7 + $0x170] sm:$0xff]  ;;  %v275_v56 = vld [vmem:[%s3883_s7 + $0x178] sm:$0xff] }
  0x20   : > { %v276_v57 = vld [vmem:[%s3883_s7 + $0x180] sm:$0xff]  ;;  %v277_v58 = vld [vmem:[%s3883_s7 + $0x188] sm:$0xff]  ;;  %v278_v59 = vld [vmem:[%s3883_s7 + $0x190] sm:$0xff] }
  0x21   : > { %v279_v60 = vld [vmem:[%s3883_s7 + $0x198] sm:$0xff]  ;;  %v280_v61 = vld [vmem:[%s3883_s7 + $0x1a0] sm:$0xff]  ;;  %v281_v62 = vld [vmem:[%s3883_s7 + $0x1a8] sm:$0xff] }
  0x22   : > { %3421 = vmatmul.mubr.msk.f32.gmra.mrb[8].mxu0 %vm367_vm0, %v237_v15  ;;  %v282_v63 = vld [vmem:[%s3883_s7 + $0x1b0] sm:$0xff]  ;;  %v283_v0 = vld [vmem:[%s3883_s7 + $0x1b8] sm:$0xff]  ;;  %v284_v1 = vld [vmem:[%s3883_s7 + $0x1c0] sm:$0xff] }
  0x23   : > { %3423 = vmatprep.mubr.msk.f32.mxu0 %vm367_vm0, %v238_v16  ;;  %v285_v2 = vld [vmem:[%s3883_s7 + $0x1c8] sm:$0xff]  ;;  %v286_v3 = vld [vmem:[%s3883_s7 + $0x1d0] sm:$0xff]  ;;  %v287_v4 = vld [vmem:[%s3883_s7 + $0x1d8] sm:$0xff] }
  0x24   : > { %v288_v5 = vld [vmem:[%s3883_s7 + $0x1e0] sm:$0xff]  ;;  %v289_v6 = vld [vmem:[%s3883_s7 + $0x1e8] sm:$0xff]  ;;  %v290_v7 = vld [vmem:[%s3883_s7 + $0x1f0] sm:$0xff] }
  0x25   : > { %v291_v8 = vld [vmem:[%s3883_s7 + $0x1f8] sm:$0xff]  ;;  %v292_v9 = vld [vmem:[%s3883_s7 + $0x200] sm:$0xff]  ;;  %v293_v10 = vld [vmem:[%s3883_s7 + $0x208] sm:$0xff] }
  0x26   : > { %3424 = vmatmul.mubr.msk.f32.gmra.mrb[10].mxu0 %vm367_vm0, %v239_v17  ;;  %v294_v11 = vld [vmem:[%s3883_s7 + $0x210] sm:$0xff]  ;;  %v295_v12 = vld [vmem:[%s3883_s7 + $0x218] sm:$0xff]  ;;  %v296_v13 = vld [vmem:[%s3883_s7 + $0x220] sm:$0xff] }
  0x27   : > { %3426 = vmatprep.mubr.msk.f32.mxu0 %vm367_vm0, %v240_v18  ;;  %v297_v14 = vld [vmem:[%s3883_s7 + $0x228] sm:$0xff]  ;;  %v298_v15 = vld [vmem:[%s3883_s7 + $0x230] sm:$0xff]  ;;  %v299_v16 = vld [vmem:[%s3883_s7 + $0x238] sm:$0xff] }
  0x28   : > { %v300_v17 = vld [vmem:[%s3883_s7 + $0x240] sm:$0xff]  ;;  %v301_v18 = vld [vmem:[%s3883_s7 + $0x248] sm:$0xff]  ;;  %v334_v51 = vld [vmem:[%s3883_s7 + $0x350] sm:$0xff] }
  0x29   : > { %v336_v54 = vld [vmem:[%s3883_s7 + $0x360] sm:$0xff] }
  0x2a   : > { %3427 = vmatmul.mubr.msk.f32.gmra.mrb[12].mxu0 %vm367_vm0, %v241_v19  ;;  %v302_v19 = vld [vmem:[%s3883_s7 + $0x250] sm:$0xff] }
  0x2b   : > { %3429 = vmatprep.mubr.msk.f32.mxu0 %vm367_vm0, %v242_v20  ;;  %v303_v20 = vld [vmem:[%s3883_s7 + $0x258] sm:$0xff] }
  0x2e   : > { %3430 = vmatmul.mubr.msk.f32.gmra.mrb[14].mxu0 %vm367_vm0, %v243_v21  ;;  %v304_v21 = vld [vmem:[%s3883_s7 + $0x260] sm:$0xff] }
  0x2f   : > { %3432 = vmatprep.mubr.msk.f32.mxu0 %vm367_vm0, %v244_v22  ;;  %v305_v22 = vld [vmem:[%s3883_s7 + $0x268] sm:$0xff] }
  0x32   : > { %3433 = vmatmul.mubr.msk.f32.gmra.mrb[16].mxu0 %vm367_vm0, %v245_v23  ;;  %v306_v23 = vld [vmem:[%s3883_s7 + $0x270] sm:$0xff] }
  0x33   : > { %3435 = vmatprep.mubr.msk.f32.mxu0 %vm367_vm0, %v246_v24  ;;  %v307_v24 = vld [vmem:[%s3883_s7 + $0x278] sm:$0xff] }
  0x36   : > { %3436 = vmatmul.mubr.msk.f32.gmra.mrb[18].mxu0 %vm367_vm0, %v247_v25  ;;  %v308_v25 = vld [vmem:[%s3883_s7 + $0x280] sm:$0xff] }
  0x37   : > { %3438 = vmatprep.mubr.msk.f32.mxu0 %vm367_vm0, %v248_v26  ;;  %v309_v26 = vld [vmem:[%s3883_s7 + $0x288] sm:$0xff] }
  0x3a   : > { %3439 = vmatmul.mubr.msk.f32.gmra.mrb[20].mxu0 %vm367_vm0, %v249_v27  ;;  %v310_v27 = vld [vmem:[%s3883_s7 + $0x290] sm:$0xff] }
  0x3b   : > { %3441 = vmatprep.mubr.msk.f32.mxu0 %vm367_vm0, %v250_v28  ;;  %v311_v28 = vld [vmem:[%s3883_s7 + $0x298] sm:$0xff] }
  0x3e   : > { %3442 = vmatmul.mubr.msk.f32.gmra.mrb[22].mxu0 %vm367_vm0, %v251_v29  ;;  %v312_v29 = vld [vmem:[%s3883_s7 + $0x2a0] sm:$0xff] }
  0x3f   : > { %3444 = vmatprep.mubr.msk.f32.mxu0 %vm367_vm0, %v252_v30  ;;  %v313_v30 = vld [vmem:[%s3883_s7 + $0x2a8] sm:$0xff] }
  0x42   : > { %3445 = vmatmul.mubr.msk.f32.gmra.mrb[24].mxu0 %vm367_vm0, %v253_v31  ;;  %v314_v31 = vld [vmem:[%s3883_s7 + $0x2b0] sm:$0xff] }
  0x43   : > { %3447 = vmatprep.mubr.msk.f32.mxu0 %vm367_vm0, %v254_v32  ;;  %v315_v32 = vld [vmem:[%s3883_s7 + $0x2b8] sm:$0xff] }
  0x46   : > { %3448 = vmatmul.mubr.msk.f32.gmra.mrb[26].mxu0 %vm367_vm0, %v255_v33  ;;  %v316_v33 = vld [vmem:[%s3883_s7 + $0x2c0] sm:$0xff] }
  0x47   : > { %3450 = vmatprep.mubr.msk.f32.mxu0 %vm367_vm0, %v256_v34  ;;  %v317_v34 = vld [vmem:[%s3883_s7 + $0x2c8] sm:$0xff] }
  0x4a   : > { %3451 = vmatmul.mubr.msk.f32.gmra.mrb[28].mxu0 %vm367_vm0, %v257_v35  ;;  %v318_v35 = vld [vmem:[%s3883_s7 + $0x2d0] sm:$0xff] }
  0x4b   : > { %3453 = vmatprep.mubr.msk.f32.mxu0 %vm367_vm0, %v258_v36  ;;  %v319_v36 = vld [vmem:[%s3883_s7 + $0x2d8] sm:$0xff] }
  0x4e   : > { %3454 = vmatmul.mubr.msk.f32.gmra.mrb[30].mxu0 %vm367_vm0, %v259_v37  ;;  %v320_v37 = vld [vmem:[%s3883_s7 + $0x2e0] sm:$0xff] }
  0x4f   : > { %3456 = vmatprep.mubr.msk.f32.mxu0 %vm367_vm0, %v260_v38  ;;  %v321_v38 = vld [vmem:[%s3883_s7 + $0x2e8] sm:$0xff] }
  0x52   : > { %3457 = vmatmul.mubr.msk.f32.gmra.mrb[32].mxu0 %vm367_vm0, %v261_v39  ;;  %v322_v39 = vld [vmem:[%s3883_s7 + $0x2f0] sm:$0xff] }
  0x53   : > { %3459 = vmatprep.mubr.msk.f32.mxu0 %vm367_vm0, %v262_v40  ;;  %v323_v40 = vld [vmem:[%s3883_s7 + $0x2f8] sm:$0xff] }
  0x56   : > { %3460 = vmatmul.mubr.msk.f32.gmra.mrb[34].mxu0 %vm367_vm0, %v263_v41  ;;  %v324_v41 = vld [vmem:[%s3883_s7 + $0x300] sm:$0xff] }
  0x57   : > { %3462 = vmatprep.mubr.msk.f32.mxu0 %vm367_vm0, %v264_v42  ;;  %v325_v42 = vld [vmem:[%s3883_s7 + $0x308] sm:$0xff] }
  0x5a   : > { %3463 = vmatmul.mubr.msk.f32.gmra.mrb[36].mxu0 %vm367_vm0, %v265_v43  ;;  %v326_v43 = vld [vmem:[%s3883_s7 + $0x310] sm:$0xff] }
  0x5b   : > { %3465 = vmatprep.mubr.msk.f32.mxu0 %vm367_vm0, %v266_v44  ;;  %v327_v44 = vld [vmem:[%s3883_s7 + $0x318] sm:$0xff] }
  0x5e   : > { %3466 = vmatmul.mubr.msk.f32.gmra.mrb[38].mxu0 %vm367_vm0, %v267_v45  ;;  %v328_v45 = vld [vmem:[%s3883_s7 + $0x320] sm:$0xff] }
  0x5f   : > { %3468 = vmatprep.mubr.msk.f32.mxu0 %vm367_vm0, %v268_v46  ;;  %v329_v46 = vld [vmem:[%s3883_s7 + $0x328] sm:$0xff] }
  0x62   : > { %3469 = vmatmul.mubr.msk.f32.gmra.mrb[40].mxu0 %vm367_vm0, %v269_v47  ;;  %v330_v47 = vld [vmem:[%s3883_s7 + $0x330] sm:$0xff] }
  0x63   : > { %3471 = vmatprep.mubr.msk.f32.mxu0 %vm367_vm0, %v270_v48  ;;  %v331_v48 = vld [vmem:[%s3883_s7 + $0x338] sm:$0xff] }
  0x66   : > { %3472 = vmatmul.mubr.msk.f32.gmra.mrb[42].mxu0 %vm367_vm0, %v271_v49  ;;  %v332_v49 = vld [vmem:[%s3883_s7 + $0x340] sm:$0xff] }
  0x67   : > { %3474 = vmatprep.mubr.msk.f32.mxu0 %vm367_vm0, %v272_v50  ;;  %v333_v50 = vld [vmem:[%s3883_s7 + $0x348] sm:$0xff] }
  0x6a   : > { %3475 = vmatmul.mubr.msk.f32.gmra.mrb[44].mxu0 %vm367_vm0, %v273_v53  ;;  %v335_v53 = vld [vmem:[%s3883_s7 + $0x358] sm:$0xff] }
  0x6b   : > { %3477 = vmatprep.mubr.msk.f32.mxu0 %vm367_vm0, %v274_v55 }
  0x6e   : > { %3478 = vmatmul.mubr.msk.f32.gmra.mrb[46].mxu0 %vm367_vm0, %v275_v56 }
  0x6f   : > { %3480 = vmatprep.mubr.msk.f32.mxu0 %vm367_vm0, %v276_v57 }
  0x72   : > { %3481 = vmatmul.mubr.msk.f32.gmra.mrb[48].mxu0 %vm367_vm0, %v277_v58 }
  0x73   : > { %3483 = vmatprep.mubr.msk.f32.mxu0 %vm367_vm0, %v278_v59  ;;  %v337_v59 = vld [vmem:[%s3883_s7 + $0x368] sm:$0xff] }
  0x76   : > { %3484 = vmatmul.mubr.msk.f32.gmra.mrb[50].mxu0 %vm367_vm0, %v279_v60  ;;  %v338_v60 = vld [vmem:[%s3883_s7 + $0x370] sm:$0xff] }
  0x77   : > { %3486 = vmatprep.mubr.msk.f32.mxu0 %vm367_vm0, %v280_v61 }
  0x7a   : > { %3487 = vmatmul.mubr.msk.f32.gmra.mrb[52].mxu0 %vm367_vm0, %v281_v62 }
  0x7b   : > { %3489 = vmatprep.mubr.msk.f32.mxu0 %vm367_vm0, %v282_v63 }
  0x7e   : > { %3490 = vmatmul.mubr.msk.f32.gmra.mrb[54].mxu0 %vm367_vm0, %v283_v0 }
  0x7f   : > { %3492 = vmatprep.mubr.msk.f32.mxu0 %vm367_vm0, %v284_v1 }
  0x82   : > { %3493 = vmatmul.mubr.msk.f32.gmra.mrb[56].mxu0 %vm367_vm0, %v285_v2 }
  0x83   : > { %3495 = vmatprep.mubr.msk.f32.mxu0 %vm367_vm0, %v286_v3  ;;  %v339_v3 = vld [vmem:[%s3883_s7 + $0x378] sm:$0xff] }
  0x86   : > { %3496 = vmatmul.mubr.msk.f32.gmra.mrb[58].mxu0 %vm367_vm0, %v287_v4  ;;  %v340_v4 = vld [vmem:[%s3883_s7 + $0x380] sm:$0xff] }
  0x87   : > { %3498 = vmatprep.mubr.msk.f32.mxu0 %vm367_vm0, %v288_v5 }
  0x8a   : > { %3499 = vmatmul.mubr.msk.f32.gmra.mrb[60].mxu0 %vm367_vm0, %v289_v6 }
  0x8b   : > { %3501 = vmatprep.mubr.msk.f32.mxu0 %vm367_vm0, %v290_v7 }
  0x8e   : > { %3502 = vmatmul.mubr.msk.f32.gmra.mrb[62].mxu0 %vm367_vm0, %v291_v8 }
  0x8f   : > { %3504 = vmatprep.mubr.msk.f32.mxu0 %vm367_vm0, %v292_v9 }
  0x92   : > { %3505 = vmatmul.mubr.msk.f32.gmra.mrb[64].mxu0 %vm367_vm0, %v293_v10 }
  0x93   : > { %3507 = vmatprep.mubr.msk.f32.mxu0 %vm367_vm0, %v294_v11  ;;  %v341_v11 = vld [vmem:[%s3883_s7 + $0x388] sm:$0xff] }
  0x96   : > { %3508 = vmatmul.mubr.msk.f32.gmra.mrb[66].mxu0 %vm367_vm0, %v295_v12  ;;  %v342_v12 = vld [vmem:[%s3883_s7 + $0x390] sm:$0xff] }
  0x97   : > { %3510 = vmatprep.mubr.msk.f32.mxu0 %vm367_vm0, %v296_v13 }
  0x9a   : > { %3511 = vmatmul.mubr.msk.f32.gmra.mrb[68].mxu0 %vm367_vm0, %v297_v14 }
  0x9b   : > { %3513 = vmatprep.mubr.msk.f32.mxu0 %vm367_vm0, %v298_v15 }
  0x9e   : > { %3514 = vmatmul.mubr.msk.f32.gmra.mrb[70].mxu0 %vm367_vm0, %v299_v16 }
  0x9f   : > { %3516 = vmatprep.mubr.msk.f32.mxu0 %vm367_vm0, %v300_v17 }
  0xa2   : > { %3517 = vmatmul.mubr.msk.f32.gmra.mrb[72].mxu0 %vm367_vm0, %v301_v18 }
  0xa3   : > { %3519 = vmatprep.mubr.msk.f32.mxu0 %vm367_vm0, %v302_v19  ;;  %v343_v19 = vld [vmem:[%s3883_s7 + $0x398] sm:$0xff] }
  0xa6   : > { %3520 = vmatmul.mubr.msk.f32.gmra.mrb[74].mxu0 %vm367_vm0, %v303_v20  ;;  %v344_v20 = vld [vmem:[%s3883_s7 + $0x3a0] sm:$0xff] }
  0xa7   : > { %3522 = vmatprep.mubr.msk.f32.mxu0 %vm367_vm0, %v304_v21 }
  0xaa   : > { %3523 = vmatmul.mubr.msk.f32.gmra.mrb[76].mxu0 %vm367_vm0, %v305_v22 }
  0xab   : > { %3525 = vmatprep.mubr.msk.f32.mxu0 %vm367_vm0, %v306_v23 }
  0xae   : > { %3526 = vmatmul.mubr.msk.f32.gmra.mrb[78].mxu0 %vm367_vm0, %v307_v24 }
  0xaf   : > { %3528 = vmatprep.mubr.msk.f32.mxu0 %vm367_vm0, %v308_v25 }
  0xb2   : > { %3529 = vmatmul.mubr.msk.f32.gmra.mrb[80].mxu0 %vm367_vm0, %v309_v26 }
  0xb3   : > { %3531 = vmatprep.mubr.msk.f32.mxu0 %vm367_vm0, %v310_v27  ;;  %v345_v27 = vld [vmem:[%s3883_s7 + $0x3a8] sm:$0xff] }
  0xb6   : > { %3532 = vmatmul.mubr.msk.f32.gmra.mrb[82].mxu0 %vm367_vm0, %v311_v28  ;;  %v346_v28 = vld [vmem:[%s3883_s7 + $0x3b0] sm:$0xff] }
  0xb7   : > { %3534 = vmatprep.mubr.msk.f32.mxu0 %vm367_vm0, %v312_v29 }
  0xba   : > { %3535 = vmatmul.mubr.msk.f32.gmra.mrb[84].mxu0 %vm367_vm0, %v313_v30 }
  0xbb   : > { %3537 = vmatprep.mubr.msk.f32.mxu0 %vm367_vm0, %v314_v31 }
  0xbe   : > { %3538 = vmatmul.mubr.msk.f32.gmra.mrb[86].mxu0 %vm367_vm0, %v315_v32 }
  0xbf   : > { %3540 = vmatprep.mubr.msk.f32.mxu0 %vm367_vm0, %v316_v33 }
  0xc2   : > { %3541 = vmatmul.mubr.msk.f32.gmra.mrb[88].mxu0 %vm367_vm0, %v317_v34 }
  0xc3   : > { %3543 = vmatprep.mubr.msk.f32.mxu0 %vm367_vm0, %v318_v35  ;;  %v347_v35 = vld [vmem:[%s3883_s7 + $0x3b8] sm:$0xff] }
  0xc6   : > { %3544 = vmatmul.mubr.msk.f32.gmra.mrb[90].mxu0 %vm367_vm0, %v319_v36  ;;  %v348_v36 = vld [vmem:[%s3883_s7 + $0x3c0] sm:$0xff] }
  0xc7   : > { %3546 = vmatprep.mubr.msk.f32.mxu0 %vm367_vm0, %v320_v37 }
  0xca   : > { %3547 = vmatmul.mubr.msk.f32.gmra.mrb[92].mxu0 %vm367_vm0, %v321_v38 }
  0xcb   : > { %3549 = vmatprep.mubr.msk.f32.mxu0 %vm367_vm0, %v322_v39 }
  0xce   : > { %3550 = vmatmul.mubr.msk.f32.gmra.mrb[94].mxu0 %vm367_vm0, %v323_v40 }
  0xcf   : > { %3552 = vmatprep.mubr.msk.f32.mxu0 %vm367_vm0, %v324_v41 }
  0xd2   : > { %3553 = vmatmul.mubr.msk.f32.gmra.mrb[96].mxu0 %vm367_vm0, %v325_v42 }
  0xd3   : > { %3555 = vmatprep.mubr.msk.f32.mxu0 %vm367_vm0, %v326_v43  ;;  %v349_v43 = vld [vmem:[%s3883_s7 + $0x3c8] sm:$0xff] }
  0xd6   : > { %3556 = vmatmul.mubr.msk.f32.gmra.mrb[98].mxu0 %vm367_vm0, %v327_v44  ;;  %v350_v44 = vld [vmem:[%s3883_s7 + $0x3d0] sm:$0xff] }
  0xd7   : > { %3558 = vmatprep.mubr.msk.f32.mxu0 %vm367_vm0, %v328_v45 }
  0xda   : > { %3559 = vmatmul.mubr.msk.f32.gmra.mrb[100].mxu0 %vm367_vm0, %v329_v46 }
  0xdb   : > { %3561 = vmatprep.mubr.msk.f32.mxu0 %vm367_vm0, %v330_v47 }
  0xde   : > { %3562 = vmatmul.mubr.msk.f32.gmra.mrb[102].mxu0 %vm367_vm0, %v331_v48 }
  0xdf   : > { %3564 = vmatprep.mubr.msk.f32.mxu0 %vm367_vm0, %v332_v49 }
  0xe2   : > { %3565 = vmatmul.mubr.msk.f32.gmra.mrb[104].mxu0 %vm367_vm0, %v333_v50 }
  0xe3   : > { %3567 = vmatprep.mubr.msk.f32.mxu0 %vm367_vm0, %v334_v51  ;;  %v351_v51 = vld [vmem:[%s3883_s7 + $0x3d8] sm:$0xff] }
  0xe5   : > { %v3410_v55 = vpop.f32.mrb[0].mxu0 }
  0xe6   : > { %v824_v56 = vadd.f32 %v3410_v55, %v4107_v52  ;;  %v818_v57 = vpop.f32.mrb[1].mxu0  ;;  %3568 = vmatmul.mubr.msk.f32.gmra.mrb[106].mxu0 %vm367_vm0, %v335_v53  ;;  %v352_v53 = vld [vmem:[%s3883_s7 + $0x3e0] sm:$0xff] }
  0xe7   : > { %v819_v58 = vadd.f32 %v4107_v52, %v818_v57  ;;  %3570 = vmatprep.mubr.msk.f32.mxu0 %vm367_vm0, %v336_v54 }
  0xe8   : > { %v1458_v63 = vmax.f32 %v824_v56, 0.0 }
  0xe9   : > { %v1457_v61 = vmax.f32 %v819_v58, 0.0  ;;  %v3413_v62 = vpop.f32.mrb[2].mxu0 }
  0xea   : > { %v834_v0 = vadd.f32 %v3413_v62, %v4107_v52  ;;  %v828_v1 = vpop.f32.mrb[3].mxu0  ;;  %3571 = vmatmul.mubr.msk.f32.gmra.mrb[108].mxu0 %vm367_vm0, %v337_v59 }
  0xeb   : > { %v829_v2 = vadd.f32 %v4107_v52, %v828_v1  ;;  %3604 = vmatprep.mubr.msk.f32.mxu1 %vm1594_vm1, %v1457_v61  ;;  %3573 = vmatprep.mubr.msk.f32.mxu0 %vm367_vm0, %v338_v60  ;;  %v353_v60 = vld [vmem:[%s3883_s7 + $0x3e8] sm:$0xff]  ;;  %v354_v61 = vld [vmem:[%s3883_s7 + $0x3f0] sm:$0xff] }
  0xec   : > { %3605 = vmatmul.mubr.msk.f32.vlgmr.msra.gmra.mrb[0].mxu1 %vm1594_vm1, %v1458_v63  ;;  %v1460_v7 = vmax.f32 %v834_v0, 0.0 }
  0xed   : > { %v1459_v5 = vmax.f32 %v829_v2, 0.0  ;;  %v3416_v6 = vpop.f32.mrb[4].mxu0 }
  0xee   : > { %v844_v8 = vadd.f32 %v3416_v6, %v4107_v52  ;;  %v838_v9 = vpop.f32.mrb[5].mxu0  ;;  %3574 = vmatmul.mubr.msk.f32.gmra.mrb[110].mxu0 %vm367_vm0, %v339_v3 }
  0xef   : > { %v839_v10 = vadd.f32 %v4107_v52, %v838_v9  ;;  %3607 = vmatprep.mubr.msk.f32.mxu1 %vm1594_vm1, %v1459_v5  ;;  %3576 = vmatprep.mubr.msk.f32.mxu0 %vm367_vm0, %v340_v4  ;;  %v355_v4 = vld [vmem:[%s3883_s7 + $0x3f8] sm:$0xff] }
  0xf0   : > { %3608 = vmatmul.mubr.msk.f32.gmra.mrb[2].mxu1 %vm1594_vm1, %v1460_v7  ;;  %v1462_v15 = vmax.f32 %v844_v8, 0.0 }
  0xf1   : > { %v1461_v13 = vmax.f32 %v839_v10, 0.0  ;;  %v3419_v14 = vpop.f32.mrb[6].mxu0 }
  0xf2   : > { %v854_v16 = vadd.f32 %v3419_v14, %v4107_v52  ;;  %v848_v17 = vpop.f32.mrb[7].mxu0  ;;  %3577 = vmatmul.mubr.msk.f32.gmra.mrb[112].mxu0 %vm367_vm0, %v341_v11 }
  0xf3   : > { %v849_v18 = vadd.f32 %v4107_v52, %v848_v17  ;;  %3610 = vmatprep.mubr.msk.f32.mxu1 %vm1594_vm1, %v1461_v13  ;;  %3579 = vmatprep.mubr.msk.f32.mxu0 %vm367_vm0, %v342_v12 }
  0xf4   : > { %3611 = vmatmul.mubr.msk.f32.gmra.mrb[4].mxu1 %vm1594_vm1, %v1462_v15  ;;  %v1464_v23 = vmax.f32 %v854_v16, 0.0 }
  0xf5   : > { %v1463_v21 = vmax.f32 %v849_v18, 0.0  ;;  %v3422_v22 = vpop.f32.mrb[8].mxu0 }
  0xf6   : > { %v864_v24 = vadd.f32 %v3422_v22, %v4107_v52  ;;  %v858_v25 = vpop.f32.mrb[9].mxu0  ;;  %3580 = vmatmul.mubr.msk.f32.gmra.mrb[114].mxu0 %vm367_vm0, %v343_v19 }
  0xf7   : > { %v859_v26 = vadd.f32 %v4107_v52, %v858_v25  ;;  %3613 = vmatprep.mubr.msk.f32.mxu1 %vm1594_vm1, %v1463_v21  ;;  %3582 = vmatprep.mubr.msk.f32.mxu0 %vm367_vm0, %v344_v20 }
  0xf8   : > { %3614 = vmatmul.mubr.msk.f32.gmra.mrb[6].mxu1 %vm1594_vm1, %v1464_v23  ;;  %v1466_v31 = vmax.f32 %v864_v24, 0.0 }
  0xf9   : > { %v1465_v29 = vmax.f32 %v859_v26, 0.0  ;;  %v3425_v30 = vpop.f32.mrb[10].mxu0 }
  0xfa   : > { %v874_v32 = vadd.f32 %v3425_v30, %v4107_v52  ;;  %v868_v33 = vpop.f32.mrb[11].mxu0  ;;  %3583 = vmatmul.mubr.msk.f32.gmra.mrb[116].mxu0 %vm367_vm0, %v345_v27 }
  0xfb   : > { %v869_v34 = vadd.f32 %v4107_v52, %v868_v33  ;;  %3616 = vmatprep.mubr.msk.f32.mxu1 %vm1594_vm1, %v1465_v29  ;;  %3585 = vmatprep.mubr.msk.f32.mxu0 %vm367_vm0, %v346_v28 }
  0xfc   : > { %3617 = vmatmul.mubr.msk.f32.gmra.mrb[8].mxu1 %vm1594_vm1, %v1466_v31  ;;  %v1468_v39 = vmax.f32 %v874_v32, 0.0 }
  0xfd   : > { %v1467_v37 = vmax.f32 %v869_v34, 0.0  ;;  %v3428_v38 = vpop.f32.mrb[12].mxu0 }
  0xfe   : > { %v884_v40 = vadd.f32 %v3428_v38, %v4107_v52  ;;  %v878_v41 = vpop.f32.mrb[13].mxu0  ;;  %3586 = vmatmul.mubr.msk.f32.gmra.mrb[118].mxu0 %vm367_vm0, %v347_v35 }
  0xff   : > { %v879_v42 = vadd.f32 %v4107_v52, %v878_v41  ;;  %3619 = vmatprep.mubr.msk.f32.mxu1 %vm1594_vm1, %v1467_v37  ;;  %3588 = vmatprep.mubr.msk.f32.mxu0 %vm367_vm0, %v348_v36 }
 0x100   : > { %3620 = vmatmul.mubr.msk.f32.gmra.mrb[10].mxu1 %vm1594_vm1, %v1468_v39  ;;  %v1470_v47 = vmax.f32 %v884_v40, 0.0 }
 0x101   : > { %v1469_v45 = vmax.f32 %v879_v42, 0.0  ;;  %v3431_v46 = vpop.f32.mrb[14].mxu0 }
 0x102   : > { %v894_v48 = vadd.f32 %v3431_v46, %v4107_v52  ;;  %v888_v49 = vpop.f32.mrb[15].mxu0  ;;  %3589 = vmatmul.mubr.msk.f32.gmra.mrb[120].mxu0 %vm367_vm0, %v349_v43 }
 0x103   : > { %v889_v50 = vadd.f32 %v4107_v52, %v888_v49  ;;  %3622 = vmatprep.mubr.msk.f32.mxu1 %vm1594_vm1, %v1469_v45  ;;  %3591 = vmatprep.mubr.msk.f32.mxu0 %vm367_vm0, %v350_v44 }
 0x104   : > { %3623 = vmatmul.mubr.msk.f32.gmra.mrb[12].mxu1 %vm1594_vm1, %v1470_v47  ;;  %v1472_v56 = vmax.f32 %v894_v48, 0.0 }
 0x105   : > { %v1471_v54 = vmax.f32 %v889_v50, 0.0  ;;  %v3434_v55 = vpop.f32.mrb[16].mxu0 }
 0x106   : > { %v904_v57 = vadd.f32 %v3434_v55, %v4107_v52  ;;  %v898_v58 = vpop.f32.mrb[17].mxu0  ;;  %3592 = vmatmul.mubr.msk.f32.gmra.mrb[122].mxu0 %vm367_vm0, %v351_v51 }
 0x107   : > { %v899_v59 = vadd.f32 %v4107_v52, %v898_v58  ;;  %3625 = vmatprep.mubr.msk.f32.mxu1 %vm1594_vm1, %v1471_v54  ;;  %3594 = vmatprep.mubr.msk.f32.mxu0 %vm367_vm0, %v352_v53 }
 0x108   : > { %3626 = vmatmul.mubr.msk.f32.gmra.mrb[14].mxu1 %vm1594_vm1, %v1472_v56  ;;  %v1474_v0 = vmax.f32 %v904_v57, 0.0 }
 0x109   : > { %v1473_v62 = vmax.f32 %v899_v59, 0.0  ;;  %v3437_v63 = vpop.f32.mrb[18].mxu0 }
 0x10a   : > { %v914_v1 = vadd.f32 %v3437_v63, %v4107_v52  ;;  %v908_v2 = vpop.f32.mrb[19].mxu0  ;;  %3595 = vmatmul.mubr.msk.f32.gmra.mrb[124].mxu0 %vm367_vm0, %v353_v60 }
 0x10b   : > { %v909_v3 = vadd.f32 %v4107_v52, %v908_v2  ;;  %3628 = vmatprep.mubr.msk.f32.mxu1 %vm1594_vm1, %v1473_v62  ;;  %3597 = vmatprep.mubr.msk.f32.mxu0 %vm367_vm0, %v354_v61 }
 0x10c   : > { %3629 = vmatmul.mubr.msk.f32.gmra.mrb[16].mxu1 %vm1594_vm1, %v1474_v0  ;;  %v1476_v7 = vmax.f32 %v914_v1, 0.0 }
 0x10d   : > { %v1475_v5 = vmax.f32 %v909_v3, 0.0  ;;  %v3440_v6 = vpop.f32.mrb[20].mxu0 }
 0x10e   : > { %v924_v8 = vadd.f32 %v3440_v6, %v4107_v52  ;;  %v918_v9 = vpop.f32.mrb[21].mxu0  ;;  %3598 = vmatmul.mubr.msk.f32.gmra.mrb[126].mxu0 %vm367_vm0, %v355_v4 }
 0x10f   : > { %v919_v10 = vadd.f32 %v4107_v52, %v918_v9  ;;  %3631 = vmatprep.mubr.msk.f32.mxu1 %vm1594_vm1, %v1475_v5 }
 0x110   : > { %3632 = vmatmul.mubr.msk.f32.gmra.mrb[18].mxu1 %vm1594_vm1, %v1476_v7  ;;  %v1478_v13 = vmax.f32 %v924_v8, 0.0 }
 0x111   : > { %v1477_v11 = vmax.f32 %v919_v10, 0.0  ;;  %v3443_v12 = vpop.f32.mrb[22].mxu0 }
 0x112   : > { %v934_v14 = vadd.f32 %v3443_v12, %v4107_v52  ;;  %v928_v15 = vpop.f32.mrb[23].mxu0 }
 0x113   : > { %v929_v16 = vadd.f32 %v4107_v52, %v928_v15  ;;  %3634 = vmatprep.mubr.msk.f32.mxu1 %vm1594_vm1, %v1477_v11 }
 0x114   : > { %3635 = vmatmul.mubr.msk.f32.gmra.mrb[20].mxu1 %vm1594_vm1, %v1478_v13  ;;  %v1480_v19 = vmax.f32 %v934_v14, 0.0 }
 0x115   : > { %v1479_v17 = vmax.f32 %v929_v16, 0.0  ;;  %v3446_v18 = vpop.f32.mrb[24].mxu0 }
 0x116   : > { %v944_v20 = vadd.f32 %v3446_v18, %v4107_v52  ;;  %v938_v21 = vpop.f32.mrb[25].mxu0 }
 0x117   : > { %v939_v22 = vadd.f32 %v4107_v52, %v938_v21  ;;  %3637 = vmatprep.mubr.msk.f32.mxu1 %vm1594_vm1, %v1479_v17 }
 0x118   : > { %3638 = vmatmul.mubr.msk.f32.gmra.mrb[22].mxu1 %vm1594_vm1, %v1480_v19  ;;  %v1482_v25 = vmax.f32 %v944_v20, 0.0 }
 0x119   : > { %v1481_v23 = vmax.f32 %v939_v22, 0.0  ;;  %v3449_v24 = vpop.f32.mrb[26].mxu0 }
 0x11a   : > { %v954_v26 = vadd.f32 %v3449_v24, %v4107_v52  ;;  %v948_v27 = vpop.f32.mrb[27].mxu0 }
 0x11b   : > { %v949_v28 = vadd.f32 %v4107_v52, %v948_v27  ;;  %3640 = vmatprep.mubr.msk.f32.mxu1 %vm1594_vm1, %v1481_v23 }
 0x11c   : > { %3641 = vmatmul.mubr.msk.f32.gmra.mrb[24].mxu1 %vm1594_vm1, %v1482_v25  ;;  %v1484_v31 = vmax.f32 %v954_v26, 0.0 }
 0x11d   : > { %v1483_v29 = vmax.f32 %v949_v28, 0.0  ;;  %v3452_v30 = vpop.f32.mrb[28].mxu0 }
 0x11e   : > { %v964_v32 = vadd.f32 %v3452_v30, %v4107_v52  ;;  %v958_v33 = vpop.f32.mrb[29].mxu0 }
 0x11f   : > { %v959_v34 = vadd.f32 %v4107_v52, %v958_v33  ;;  %3643 = vmatprep.mubr.msk.f32.mxu1 %vm1594_vm1, %v1483_v29 }
 0x120   : > { %3644 = vmatmul.mubr.msk.f32.gmra.mrb[26].mxu1 %vm1594_vm1, %v1484_v31  ;;  %v1486_v37 = vmax.f32 %v964_v32, 0.0 }
 0x121   : > { %v1485_v35 = vmax.f32 %v959_v34, 0.0  ;;  %v3455_v36 = vpop.f32.mrb[30].mxu0 }
 0x122   : > { %v974_v38 = vadd.f32 %v3455_v36, %v4107_v52  ;;  %v968_v39 = vpop.f32.mrb[31].mxu0 }
 0x123   : > { %v969_v40 = vadd.f32 %v4107_v52, %v968_v39  ;;  %3646 = vmatprep.mubr.msk.f32.mxu1 %vm1594_vm1, %v1485_v35 }
 0x124   : > { %3647 = vmatmul.mubr.msk.f32.gmra.mrb[28].mxu1 %vm1594_vm1, %v1486_v37  ;;  %v1488_v43 = vmax.f32 %v974_v38, 0.0 }
 0x125   : > { %v1487_v41 = vmax.f32 %v969_v40, 0.0  ;;  %v3458_v42 = vpop.f32.mrb[32].mxu0 }
 0x126   : > { %v984_v44 = vadd.f32 %v3458_v42, %v4107_v52  ;;  %v978_v45 = vpop.f32.mrb[33].mxu0 }
 0x127   : > { %v979_v46 = vadd.f32 %v4107_v52, %v978_v45  ;;  %3649 = vmatprep.mubr.msk.f32.mxu1 %vm1594_vm1, %v1487_v41 }
 0x128   : > { %3650 = vmatmul.mubr.msk.f32.gmra.mrb[30].mxu1 %vm1594_vm1, %v1488_v43  ;;  %v1490_v49 = vmax.f32 %v984_v44, 0.0 }
 0x129   : > { %v1489_v47 = vmax.f32 %v979_v46, 0.0  ;;  %v3461_v48 = vpop.f32.mrb[34].mxu0 }
 0x12a   : > { %v994_v50 = vadd.f32 %v3461_v48, %v4107_v52  ;;  %v988_v51 = vpop.f32.mrb[35].mxu0 }
 0x12b   : > { %v989_v53 = vadd.f32 %v4107_v52, %v988_v51  ;;  %3652 = vmatprep.mubr.msk.f32.mxu1 %vm1594_vm1, %v1489_v47 }
 0x12c   : > { %3653 = vmatmul.mubr.msk.f32.gmra.mrb[32].mxu1 %vm1594_vm1, %v1490_v49  ;;  %v1492_v56 = vmax.f32 %v994_v50, 0.0 }
 0x12d   : > { %v1491_v54 = vmax.f32 %v989_v53, 0.0  ;;  %v3464_v55 = vpop.f32.mrb[36].mxu0 }
 0x12e   : > { %v1004_v57 = vadd.f32 %v3464_v55, %v4107_v52  ;;  %v998_v58 = vpop.f32.mrb[37].mxu0 }
 0x12f   : > { %v999_v59 = vadd.f32 %v4107_v52, %v998_v58  ;;  %3655 = vmatprep.mubr.msk.f32.mxu1 %vm1594_vm1, %v1491_v54 }
 0x130   : > { %3656 = vmatmul.mubr.msk.f32.gmra.mrb[34].mxu1 %vm1594_vm1, %v1492_v56  ;;  %v1494_v62 = vmax.f32 %v1004_v57, 0.0 }
 0x131   : > { %v1493_v60 = vmax.f32 %v999_v59, 0.0  ;;  %v3467_v61 = vpop.f32.mrb[38].mxu0 }
 0x132   : > { %v1014_v63 = vadd.f32 %v3467_v61, %v4107_v52  ;;  %v1008_v0 = vpop.f32.mrb[39].mxu0 }
 0x133   : > { %v1009_v1 = vadd.f32 %v4107_v52, %v1008_v0  ;;  %3658 = vmatprep.mubr.msk.f32.mxu1 %vm1594_vm1, %v1493_v60 }
 0x134   : > { %3659 = vmatmul.mubr.msk.f32.gmra.mrb[36].mxu1 %vm1594_vm1, %v1494_v62  ;;  %v1496_v4 = vmax.f32 %v1014_v63, 0.0 }
 0x135   : > { %v1495_v2 = vmax.f32 %v1009_v1, 0.0  ;;  %v3470_v3 = vpop.f32.mrb[40].mxu0 }
 0x136   : > { %v1024_v5 = vadd.f32 %v3470_v3, %v4107_v52  ;;  %v1018_v6 = vpop.f32.mrb[41].mxu0 }
 0x137   : > { %v1019_v7 = vadd.f32 %v4107_v52, %v1018_v6  ;;  %3661 = vmatprep.mubr.msk.f32.mxu1 %vm1594_vm1, %v1495_v2 }
 0x138   : > { %3662 = vmatmul.mubr.msk.f32.gmra.mrb[38].mxu1 %vm1594_vm1, %v1496_v4  ;;  %v1498_v10 = vmax.f32 %v1024_v5, 0.0 }
 0x139   : > { %v1497_v8 = vmax.f32 %v1019_v7, 0.0  ;;  %v3473_v9 = vpop.f32.mrb[42].mxu0 }
 0x13a   : > { %v1034_v11 = vadd.f32 %v3473_v9, %v4107_v52  ;;  %v1028_v12 = vpop.f32.mrb[43].mxu0 }
 0x13b   : > { %v1029_v13 = vadd.f32 %v4107_v52, %v1028_v12  ;;  %3664 = vmatprep.mubr.msk.f32.mxu1 %vm1594_vm1, %v1497_v8 }
 0x13c   : > { %3665 = vmatmul.mubr.msk.f32.gmra.mrb[40].mxu1 %vm1594_vm1, %v1498_v10  ;;  %v1500_v16 = vmax.f32 %v1034_v11, 0.0 }
 0x13d   : > { %v1499_v14 = vmax.f32 %v1029_v13, 0.0  ;;  %v3476_v15 = vpop.f32.mrb[44].mxu0 }
 0x13e   : > { %v1044_v17 = vadd.f32 %v3476_v15, %v4107_v52  ;;  %v1038_v18 = vpop.f32.mrb[45].mxu0 }
 0x13f   : > { %v1039_v19 = vadd.f32 %v4107_v52, %v1038_v18  ;;  %3667 = vmatprep.mubr.msk.f32.mxu1 %vm1594_vm1, %v1499_v14 }
 0x140   : > { %3668 = vmatmul.mubr.msk.f32.gmra.mrb[42].mxu1 %vm1594_vm1, %v1500_v16  ;;  %v1502_v22 = vmax.f32 %v1044_v17, 0.0 }
 0x141   : > { %v1501_v20 = vmax.f32 %v1039_v19, 0.0  ;;  %v3479_v21 = vpop.f32.mrb[46].mxu0 }
 0x142   : > { %v1054_v23 = vadd.f32 %v3479_v21, %v4107_v52  ;;  %v1048_v24 = vpop.f32.mrb[47].mxu0 }
 0x143   : > { %v1049_v25 = vadd.f32 %v4107_v52, %v1048_v24  ;;  %3670 = vmatprep.mubr.msk.f32.mxu1 %vm1594_vm1, %v1501_v20 }
 0x144   : > { %3671 = vmatmul.mubr.msk.f32.gmra.mrb[44].mxu1 %vm1594_vm1, %v1502_v22  ;;  %v1504_v28 = vmax.f32 %v1054_v23, 0.0 }
 0x145   : > { %v1503_v26 = vmax.f32 %v1049_v25, 0.0  ;;  %v3482_v27 = vpop.f32.mrb[48].mxu0 }
 0x146   : > { %v1064_v29 = vadd.f32 %v3482_v27, %v4107_v52  ;;  %v1058_v30 = vpop.f32.mrb[49].mxu0 }
 0x147   : > { %v1059_v31 = vadd.f32 %v4107_v52, %v1058_v30  ;;  %3673 = vmatprep.mubr.msk.f32.mxu1 %vm1594_vm1, %v1503_v26 }
 0x148   : > { %3674 = vmatmul.mubr.msk.f32.gmra.mrb[46].mxu1 %vm1594_vm1, %v1504_v28  ;;  %v1506_v34 = vmax.f32 %v1064_v29, 0.0 }
 0x149   : > { %v1505_v32 = vmax.f32 %v1059_v31, 0.0  ;;  %v3485_v33 = vpop.f32.mrb[50].mxu0 }
 0x14a   : > { %v1074_v35 = vadd.f32 %v3485_v33, %v4107_v52  ;;  %v1068_v36 = vpop.f32.mrb[51].mxu0 }
 0x14b   : > { %v1069_v37 = vadd.f32 %v4107_v52, %v1068_v36  ;;  %3676 = vmatprep.mubr.msk.f32.mxu1 %vm1594_vm1, %v1505_v32 }
 0x14c   : > { %3677 = vmatmul.mubr.msk.f32.gmra.mrb[48].mxu1 %vm1594_vm1, %v1506_v34  ;;  %v1508_v40 = vmax.f32 %v1074_v35, 0.0 }
 0x14d   : > { %v1507_v38 = vmax.f32 %v1069_v37, 0.0  ;;  %v3488_v39 = vpop.f32.mrb[52].mxu0 }
 0x14e   : > { %v1084_v41 = vadd.f32 %v3488_v39, %v4107_v52  ;;  %v1078_v42 = vpop.f32.mrb[53].mxu0 }
 0x14f   : > { %v1079_v43 = vadd.f32 %v4107_v52, %v1078_v42  ;;  %3679 = vmatprep.mubr.msk.f32.mxu1 %vm1594_vm1, %v1507_v38 }
 0x150   : > { %3680 = vmatmul.mubr.msk.f32.gmra.mrb[50].mxu1 %vm1594_vm1, %v1508_v40  ;;  %v1510_v46 = vmax.f32 %v1084_v41, 0.0 }
 0x151   : > { %v1509_v44 = vmax.f32 %v1079_v43, 0.0  ;;  %v3491_v45 = vpop.f32.mrb[54].mxu0 }
 0x152   : > { %v1094_v47 = vadd.f32 %v3491_v45, %v4107_v52  ;;  %v1088_v48 = vpop.f32.mrb[55].mxu0 }
 0x153   : > { %v1089_v49 = vadd.f32 %v4107_v52, %v1088_v48  ;;  %3682 = vmatprep.mubr.msk.f32.mxu1 %vm1594_vm1, %v1509_v44 }
 0x154   : > { %3683 = vmatmul.mubr.msk.f32.gmra.mrb[52].mxu1 %vm1594_vm1, %v1510_v46  ;;  %v1512_v53 = vmax.f32 %v1094_v47, 0.0 }
 0x155   : > { %v1511_v50 = vmax.f32 %v1089_v49, 0.0  ;;  %v3494_v51 = vpop.f32.mrb[56].mxu0 }
 0x156   : > { %v1104_v54 = vadd.f32 %v3494_v51, %v4107_v52  ;;  %v1098_v55 = vpop.f32.mrb[57].mxu0 }
 0x157   : > { %v1099_v56 = vadd.f32 %v4107_v52, %v1098_v55  ;;  %3685 = vmatprep.mubr.msk.f32.mxu1 %vm1594_vm1, %v1511_v50 }
 0x158   : > { %3686 = vmatmul.mubr.msk.f32.gmra.mrb[54].mxu1 %vm1594_vm1, %v1512_v53  ;;  %v1514_v59 = vmax.f32 %v1104_v54, 0.0 }
 0x159   : > { %v1513_v57 = vmax.f32 %v1099_v56, 0.0  ;;  %v3497_v58 = vpop.f32.mrb[58].mxu0 }
 0x15a   : > { %v1114_v60 = vadd.f32 %v3497_v58, %v4107_v52  ;;  %v1108_v61 = vpop.f32.mrb[59].mxu0 }
 0x15b   : > { %v1109_v62 = vadd.f32 %v4107_v52, %v1108_v61  ;;  %3688 = vmatprep.mubr.msk.f32.mxu1 %vm1594_vm1, %v1513_v57 }
 0x15c   : > { %3689 = vmatmul.mubr.msk.f32.gmra.mrb[56].mxu1 %vm1594_vm1, %v1514_v59  ;;  %v1516_v1 = vmax.f32 %v1114_v60, 0.0 }
 0x15d   : > { %v1515_v63 = vmax.f32 %v1109_v62, 0.0  ;;  %v3500_v0 = vpop.f32.mrb[60].mxu0 }
 0x15e   : > { %v1124_v2 = vadd.f32 %v3500_v0, %v4107_v52  ;;  %v1118_v3 = vpop.f32.mrb[61].mxu0 }
 0x15f   : > { %v1119_v4 = vadd.f32 %v4107_v52, %v1118_v3  ;;  %3691 = vmatprep.mubr.msk.f32.mxu1 %vm1594_vm1, %v1515_v63 }
 0x160   : > { %3692 = vmatmul.mubr.msk.f32.gmra.mrb[58].mxu1 %vm1594_vm1, %v1516_v1  ;;  %v1518_v7 = vmax.f32 %v1124_v2, 0.0 }
 0x161   : > { %v1517_v5 = vmax.f32 %v1119_v4, 0.0  ;;  %v3503_v6 = vpop.f32.mrb[62].mxu0 }
 0x162   : > { %v1134_v8 = vadd.f32 %v3503_v6, %v4107_v52  ;;  %v1128_v9 = vpop.f32.mrb[63].mxu0 }
 0x163   : > { %v1129_v10 = vadd.f32 %v4107_v52, %v1128_v9  ;;  %3694 = vmatprep.mubr.msk.f32.mxu1 %vm1594_vm1, %v1517_v5 }
 0x164   : > { %3695 = vmatmul.mubr.msk.f32.gmra.mrb[60].mxu1 %vm1594_vm1, %v1518_v7  ;;  %v1520_v13 = vmax.f32 %v1134_v8, 0.0 }
 0x165   : > { %v1519_v11 = vmax.f32 %v1129_v10, 0.0  ;;  %v3506_v12 = vpop.f32.mrb[64].mxu0 }
 0x166   : > { %v1144_v14 = vadd.f32 %v3506_v12, %v4107_v52  ;;  %v1138_v15 = vpop.f32.mrb[65].mxu0 }
 0x167   : > { %v1139_v16 = vadd.f32 %v4107_v52, %v1138_v15  ;;  %3697 = vmatprep.mubr.msk.f32.mxu1 %vm1594_vm1, %v1519_v11 }
 0x168   : > { %3698 = vmatmul.mubr.msk.f32.gmra.mrb[62].mxu1 %vm1594_vm1, %v1520_v13  ;;  %v1522_v19 = vmax.f32 %v1144_v14, 0.0 }
 0x169   : > { %v1521_v17 = vmax.f32 %v1139_v16, 0.0  ;;  %v3509_v18 = vpop.f32.mrb[66].mxu0 }
 0x16a   : > { %v1154_v20 = vadd.f32 %v3509_v18, %v4107_v52  ;;  %v1148_v21 = vpop.f32.mrb[67].mxu0 }
 0x16b   : > { %v1149_v22 = vadd.f32 %v4107_v52, %v1148_v21  ;;  %3700 = vmatprep.mubr.msk.f32.mxu1 %vm1594_vm1, %v1521_v17 }
 0x16c   : > { %3701 = vmatmul.mubr.msk.f32.gmra.mrb[64].mxu1 %vm1594_vm1, %v1522_v19  ;;  %v1524_v25 = vmax.f32 %v1154_v20, 0.0 }
 0x16d   : > { %v1523_v23 = vmax.f32 %v1149_v22, 0.0  ;;  %v3512_v24 = vpop.f32.mrb[68].mxu0 }
 0x16e   : > { %v1164_v26 = vadd.f32 %v3512_v24, %v4107_v52  ;;  %v1158_v27 = vpop.f32.mrb[69].mxu0 }
 0x16f   : > { %v1159_v28 = vadd.f32 %v4107_v52, %v1158_v27  ;;  %3703 = vmatprep.mubr.msk.f32.mxu1 %vm1594_vm1, %v1523_v23 }
 0x170   : > { %3704 = vmatmul.mubr.msk.f32.gmra.mrb[66].mxu1 %vm1594_vm1, %v1524_v25  ;;  %v1526_v31 = vmax.f32 %v1164_v26, 0.0 }
 0x171   : > { %v1525_v29 = vmax.f32 %v1159_v28, 0.0  ;;  %v3515_v30 = vpop.f32.mrb[70].mxu0 }
 0x172   : > { %v1174_v32 = vadd.f32 %v3515_v30, %v4107_v52  ;;  %v1168_v33 = vpop.f32.mrb[71].mxu0 }
 0x173   : > { %v1169_v34 = vadd.f32 %v4107_v52, %v1168_v33  ;;  %3706 = vmatprep.mubr.msk.f32.mxu1 %vm1594_vm1, %v1525_v29 }
 0x174   : > { %3707 = vmatmul.mubr.msk.f32.gmra.mrb[68].mxu1 %vm1594_vm1, %v1526_v31  ;;  %v1528_v37 = vmax.f32 %v1174_v32, 0.0 }
 0x175   : > { %v1527_v35 = vmax.f32 %v1169_v34, 0.0  ;;  %v3518_v36 = vpop.f32.mrb[72].mxu0 }
 0x176   : > { %v1184_v38 = vadd.f32 %v3518_v36, %v4107_v52  ;;  %v1178_v39 = vpop.f32.mrb[73].mxu0 }
 0x177   : > { %v1179_v40 = vadd.f32 %v4107_v52, %v1178_v39  ;;  %3709 = vmatprep.mubr.msk.f32.mxu1 %vm1594_vm1, %v1527_v35 }
 0x178   : > { %3710 = vmatmul.mubr.msk.f32.gmra.mrb[70].mxu1 %vm1594_vm1, %v1528_v37  ;;  %v1530_v43 = vmax.f32 %v1184_v38, 0.0 }
 0x179   : > { %v1529_v41 = vmax.f32 %v1179_v40, 0.0  ;;  %v3521_v42 = vpop.f32.mrb[74].mxu0 }
 0x17a   : > { %v1194_v44 = vadd.f32 %v3521_v42, %v4107_v52  ;;  %v1188_v45 = vpop.f32.mrb[75].mxu0 }
 0x17b   : > { %v1189_v46 = vadd.f32 %v4107_v52, %v1188_v45  ;;  %3712 = vmatprep.mubr.msk.f32.mxu1 %vm1594_vm1, %v1529_v41 }
 0x17c   : > { %3713 = vmatmul.mubr.msk.f32.gmra.mrb[72].mxu1 %vm1594_vm1, %v1530_v43  ;;  %v1532_v49 = vmax.f32 %v1194_v44, 0.0 }
 0x17d   : > { %v1531_v47 = vmax.f32 %v1189_v46, 0.0  ;;  %v3524_v48 = vpop.f32.mrb[76].mxu0 }
 0x17e   : > { %v1204_v50 = vadd.f32 %v3524_v48, %v4107_v52  ;;  %v1198_v51 = vpop.f32.mrb[77].mxu0 }
 0x17f   : > { %v1199_v53 = vadd.f32 %v4107_v52, %v1198_v51  ;;  %3715 = vmatprep.mubr.msk.f32.mxu1 %vm1594_vm1, %v1531_v47 }
 0x180   : > { %3716 = vmatmul.mubr.msk.f32.gmra.mrb[74].mxu1 %vm1594_vm1, %v1532_v49  ;;  %v1534_v56 = vmax.f32 %v1204_v50, 0.0 }
 0x181   : > { %v1533_v54 = vmax.f32 %v1199_v53, 0.0  ;;  %v3527_v55 = vpop.f32.mrb[78].mxu0 }
 0x182   : > { %v1214_v57 = vadd.f32 %v3527_v55, %v4107_v52  ;;  %v1208_v58 = vpop.f32.mrb[79].mxu0 }
 0x183   : > { %v1209_v59 = vadd.f32 %v4107_v52, %v1208_v58  ;;  %3718 = vmatprep.mubr.msk.f32.mxu1 %vm1594_vm1, %v1533_v54 }
 0x184   : > { %3719 = vmatmul.mubr.msk.f32.gmra.mrb[76].mxu1 %vm1594_vm1, %v1534_v56  ;;  %v1536_v62 = vmax.f32 %v1214_v57, 0.0 }
 0x185   : > { %v1535_v60 = vmax.f32 %v1209_v59, 0.0  ;;  %v3530_v61 = vpop.f32.mrb[80].mxu0 }
 0x186   : > { %v1224_v63 = vadd.f32 %v3530_v61, %v4107_v52  ;;  %v1218_v0 = vpop.f32.mrb[81].mxu0 }
 0x187   : > { %v1219_v1 = vadd.f32 %v4107_v52, %v1218_v0  ;;  %3721 = vmatprep.mubr.msk.f32.mxu1 %vm1594_vm1, %v1535_v60 }
 0x188   : > { %3722 = vmatmul.mubr.msk.f32.gmra.mrb[78].mxu1 %vm1594_vm1, %v1536_v62  ;;  %v1538_v4 = vmax.f32 %v1224_v63, 0.0 }
 0x189   : > { %v1537_v2 = vmax.f32 %v1219_v1, 0.0  ;;  %v3533_v3 = vpop.f32.mrb[82].mxu0 }
 0x18a   : > { %v1234_v5 = vadd.f32 %v3533_v3, %v4107_v52  ;;  %v1228_v6 = vpop.f32.mrb[83].mxu0 }
 0x18b   : > { %v1229_v7 = vadd.f32 %v4107_v52, %v1228_v6  ;;  %3724 = vmatprep.mubr.msk.f32.mxu1 %vm1594_vm1, %v1537_v2 }
 0x18c   : > { %3725 = vmatmul.mubr.msk.f32.gmra.mrb[80].mxu1 %vm1594_vm1, %v1538_v4  ;;  %v1540_v10 = vmax.f32 %v1234_v5, 0.0 }
 0x18d   : > { %v1539_v8 = vmax.f32 %v1229_v7, 0.0  ;;  %v3536_v9 = vpop.f32.mrb[84].mxu0 }
 0x18e   : > { %v1244_v11 = vadd.f32 %v3536_v9, %v4107_v52  ;;  %v1238_v12 = vpop.f32.mrb[85].mxu0 }
 0x18f   : > { %v1239_v13 = vadd.f32 %v4107_v52, %v1238_v12  ;;  %3727 = vmatprep.mubr.msk.f32.mxu1 %vm1594_vm1, %v1539_v8 }
 0x190   : > { %3728 = vmatmul.mubr.msk.f32.gmra.mrb[82].mxu1 %vm1594_vm1, %v1540_v10  ;;  %v1542_v16 = vmax.f32 %v1244_v11, 0.0 }
 0x191   : > { %v1541_v14 = vmax.f32 %v1239_v13, 0.0  ;;  %v3539_v15 = vpop.f32.mrb[86].mxu0 }
 0x192   : > { %v1254_v17 = vadd.f32 %v3539_v15, %v4107_v52  ;;  %v1248_v18 = vpop.f32.mrb[87].mxu0 }
 0x193   : > { %v1249_v19 = vadd.f32 %v4107_v52, %v1248_v18  ;;  %3730 = vmatprep.mubr.msk.f32.mxu1 %vm1594_vm1, %v1541_v14 }
 0x194   : > { %3731 = vmatmul.mubr.msk.f32.gmra.mrb[84].mxu1 %vm1594_vm1, %v1542_v16  ;;  %v1544_v22 = vmax.f32 %v1254_v17, 0.0 }
 0x195   : > { %v1543_v20 = vmax.f32 %v1249_v19, 0.0  ;;  %v3542_v21 = vpop.f32.mrb[88].mxu0  ;;  %v4369_v19 = vld [vmem:[%s4816_s4] ss:$0 sm:$0xff] }
 0x196   : > { %v1264_v23 = vadd.f32 %v3542_v21, %v4107_v52  ;;  %v1258_v24 = vpop.f32.mrb[89].mxu0 }
 0x197   : > { %v1259_v25 = vadd.f32 %v4107_v52, %v1258_v24  ;;  %3733 = vmatprep.mubr.msk.f32.mxu1 %vm1594_vm1, %v1543_v20 }
 0x198   : > { %3734 = vmatmul.mubr.msk.f32.gmra.mrb[86].mxu1 %vm1594_vm1, %v1544_v22  ;;  %v1546_v28 = vmax.f32 %v1264_v23, 0.0 }
 0x199   : > { %v1545_v26 = vmax.f32 %v1259_v25, 0.0  ;;  %v3545_v27 = vpop.f32.mrb[90].mxu0 }
 0x19a   : > { %v1274_v29 = vadd.f32 %v3545_v27, %v4107_v52  ;;  %v1268_v30 = vpop.f32.mrb[91].mxu0 }
 0x19b   : > { %v1269_v31 = vadd.f32 %v4107_v52, %v1268_v30  ;;  %3736 = vmatprep.mubr.msk.f32.mxu1 %vm1594_vm1, %v1545_v26 }
 0x19c   : > { %3737 = vmatmul.mubr.msk.f32.gmra.mrb[88].mxu1 %vm1594_vm1, %v1546_v28  ;;  %v1548_v34 = vmax.f32 %v1274_v29, 0.0 }
 0x19d   : > { %v1547_v32 = vmax.f32 %v1269_v31, 0.0  ;;  %v3548_v33 = vpop.f32.mrb[92].mxu0 }
 0x19e   : > { %v1284_v35 = vadd.f32 %v3548_v33, %v4107_v52  ;;  %v1278_v36 = vpop.f32.mrb[93].mxu0 }
 0x19f   : > { %v1279_v37 = vadd.f32 %v4107_v52, %v1278_v36  ;;  %3739 = vmatprep.mubr.msk.f32.mxu1 %vm1594_vm1, %v1547_v32 }
 0x1a0   : > { %3740 = vmatmul.mubr.msk.f32.gmra.mrb[90].mxu1 %vm1594_vm1, %v1548_v34  ;;  %v1550_v40 = vmax.f32 %v1284_v35, 0.0 }
 0x1a1   : > { %v1549_v38 = vmax.f32 %v1279_v37, 0.0  ;;  %v3551_v39 = vpop.f32.mrb[94].mxu0 }
 0x1a2   : > { %v1294_v41 = vadd.f32 %v3551_v39, %v4107_v52  ;;  %v1288_v42 = vpop.f32.mrb[95].mxu0 }
 0x1a3   : > { %v1289_v43 = vadd.f32 %v4107_v52, %v1288_v42  ;;  %3742 = vmatprep.mubr.msk.f32.mxu1 %vm1594_vm1, %v1549_v38 }
 0x1a4   : > { %3743 = vmatmul.mubr.msk.f32.gmra.mrb[92].mxu1 %vm1594_vm1, %v1550_v40  ;;  %v1552_v46 = vmax.f32 %v1294_v41, 0.0 }
 0x1a5   : > { %v1551_v44 = vmax.f32 %v1289_v43, 0.0  ;;  %v3554_v45 = vpop.f32.mrb[96].mxu0 }
 0x1a6   : > { %v1304_v47 = vadd.f32 %v3554_v45, %v4107_v52  ;;  %v1298_v48 = vpop.f32.mrb[97].mxu0 }
 0x1a7   : > { %v1299_v49 = vadd.f32 %v4107_v52, %v1298_v48  ;;  %3745 = vmatprep.mubr.msk.f32.mxu1 %vm1594_vm1, %v1551_v44 }
 0x1a8   : > { %3746 = vmatmul.mubr.msk.f32.gmra.mrb[94].mxu1 %vm1594_vm1, %v1552_v46  ;;  %v1554_v53 = vmax.f32 %v1304_v47, 0.0 }
 0x1a9   : > { %v1553_v50 = vmax.f32 %v1299_v49, 0.0  ;;  %v3557_v51 = vpop.f32.mrb[98].mxu0 }
 0x1aa   : > { %v1314_v54 = vadd.f32 %v3557_v51, %v4107_v52  ;;  %v1308_v55 = vpop.f32.mrb[99].mxu0 }
 0x1ab   : > { %v1309_v56 = vadd.f32 %v4107_v52, %v1308_v55  ;;  %3748 = vmatprep.mubr.msk.f32.mxu1 %vm1594_vm1, %v1553_v50 }
 0x1ac   : > { %3749 = vmatmul.mubr.msk.f32.gmra.mrb[96].mxu1 %vm1594_vm1, %v1554_v53  ;;  %v1556_v59 = vmax.f32 %v1314_v54, 0.0 }
 0x1ad   : > { %v1555_v57 = vmax.f32 %v1309_v56, 0.0  ;;  %v3560_v58 = vpop.f32.mrb[100].mxu0 }
 0x1ae   : > { %v1324_v60 = vadd.f32 %v3560_v58, %v4107_v52  ;;  %v1318_v61 = vpop.f32.mrb[101].mxu0 }
 0x1af   : > { %v1319_v62 = vadd.f32 %v4107_v52, %v1318_v61  ;;  %3751 = vmatprep.mubr.msk.f32.mxu1 %vm1594_vm1, %v1555_v57 }
 0x1b0   : > { %3752 = vmatmul.mubr.msk.f32.gmra.mrb[98].mxu1 %vm1594_vm1, %v1556_v59  ;;  %v1558_v1 = vmax.f32 %v1324_v60, 0.0 }
 0x1b1   : > { %v1557_v63 = vmax.f32 %v1319_v62, 0.0  ;;  %v3563_v0 = vpop.f32.mrb[102].mxu0 }
 0x1b2   : > { %v1334_v2 = vadd.f32 %v3563_v0, %v4107_v52  ;;  %v1328_v3 = vpop.f32.mrb[103].mxu0 }
 0x1b3   : > { %v1329_v4 = vadd.f32 %v4107_v52, %v1328_v3  ;;  %3754 = vmatprep.mubr.msk.f32.mxu1 %vm1594_vm1, %v1557_v63 }
 0x1b4   : > { %3755 = vmatmul.mubr.msk.f32.gmra.mrb[100].mxu1 %vm1594_vm1, %v1558_v1  ;;  %v1560_v7 = vmax.f32 %v1334_v2, 0.0 }
 0x1b5   : > { %v1559_v5 = vmax.f32 %v1329_v4, 0.0  ;;  %v3566_v6 = vpop.f32.mrb[104].mxu0 }
 0x1b6   : > { %v1344_v8 = vadd.f32 %v3566_v6, %v4107_v52  ;;  %v1338_v9 = vpop.f32.mrb[105].mxu0 }
 0x1b7   : > { %v1339_v10 = vadd.f32 %v4107_v52, %v1338_v9  ;;  %3757 = vmatprep.mubr.msk.f32.mxu1 %vm1594_vm1, %v1559_v5 }
 0x1b8   : > { %3758 = vmatmul.mubr.msk.f32.gmra.mrb[102].mxu1 %vm1594_vm1, %v1560_v7  ;;  %v1562_v13 = vmax.f32 %v1344_v8, 0.0 }
 0x1b9   : > { %v1561_v11 = vmax.f32 %v1339_v10, 0.0  ;;  %v3569_v12 = vpop.f32.mrb[106].mxu0 }
 0x1ba   : > { %v1354_v14 = vadd.f32 %v3569_v12, %v4107_v52  ;;  %v1348_v15 = vpop.f32.mrb[107].mxu0 }
 0x1bb   : > { %v1349_v16 = vadd.f32 %v4107_v52, %v1348_v15  ;;  %3760 = vmatprep.mubr.msk.f32.mxu1 %vm1594_vm1, %v1561_v11 }
 0x1bc   : > { %3761 = vmatmul.mubr.msk.f32.gmra.mrb[104].mxu1 %vm1594_vm1, %v1562_v13  ;;  %v1564_v20 = vmax.f32 %v1354_v14, 0.0 }
 0x1bd   : > { %v1563_v17 = vmax.f32 %v1349_v16, 0.0  ;;  %v3572_v18 = vpop.f32.mrb[108].mxu0 }
 0x1be   : > { %v1364_v21 = vadd.f32 %v3572_v18, %v4107_v52  ;;  %v1358_v22 = vpop.f32.mrb[109].mxu0 }
 0x1bf   : > { %v1359_v23 = vadd.f32 %v4107_v52, %v1358_v22  ;;  %v3606_v24 = vpop.f32.mrb[0].mxu1  ;;  %3763 = vmatprep.mubr.msk.f32.mxu1 %vm1594_vm1, %v1563_v17 }
 0x1c0   : > { %v2051_v25 = vadd.f32 %v3606_v24, %v4369_v19  ;;  %v2045_v26 = vpop.f32.mrb[1].mxu1  ;;  %3764 = vmatmul.mubr.msk.f32.gmra.mrb[106].mxu1 %vm1594_vm1, %v1564_v20  ;;  %v1566_v30 = vmax.f32 %v1364_v21, 0.0 }
 0x1c1   : > { %v1565_v27 = vmax.f32 %v1359_v23, 0.0  ;;  %v2046_v28 = vadd.f32 %v4369_v19, %v2045_v26  ;;  %v3575_v29 = vpop.f32.mrb[110].mxu0 }
 0x1c2   : > { %2686 = vst.msk [vmem:[%s4377_s19 + $0x8] sm:$0xff] %vm2684_vm2, %v2051_v25  ;;  %v1374_v31 = vadd.f32 %v3575_v29, %v4107_v52  ;;  %v1368_v32 = vpop.f32.mrb[111].mxu0 }
 0x1c3   : > { %2685 = vst.msk [vmem:[%s4377_s19] sm:$0xff] %vm2684_vm2, %v2046_v28  ;;  %v1369_v33 = vadd.f32 %v4107_v52, %v1368_v32  ;;  %v3609_v34 = vpop.f32.mrb[2].mxu1  ;;  %3766 = vmatprep.mubr.msk.f32.mxu1 %vm1594_vm1, %v1565_v27 }
 0x1c4   : > { %v2061_v35 = vadd.f32 %v3609_v34, %v4369_v19  ;;  %v2055_v36 = vpop.f32.mrb[3].mxu1  ;;  %3767 = vmatmul.mubr.msk.f32.gmra.mrb[108].mxu1 %vm1594_vm1, %v1566_v30  ;;  %v1568_v40 = vmax.f32 %v1374_v31, 0.0 }
 0x1c5   : > { %v1567_v37 = vmax.f32 %v1369_v33, 0.0  ;;  %v2056_v38 = vadd.f32 %v4369_v19, %v2055_v36  ;;  %v3578_v39 = vpop.f32.mrb[112].mxu0 }
 0x1c6   : > { %2688 = vst.msk [vmem:[%s4377_s19 + $0x18] sm:$0xff] %vm2684_vm2, %v2061_v35  ;;  %v1384_v41 = vadd.f32 %v3578_v39, %v4107_v52  ;;  %v1378_v42 = vpop.f32.mrb[113].mxu0 }
 0x1c7   : > { %2687 = vst.msk [vmem:[%s4377_s19 + $0x10] sm:$0xff] %vm2684_vm2, %v2056_v38  ;;  %v1379_v43 = vadd.f32 %v4107_v52, %v1378_v42  ;;  %v3612_v44 = vpop.f32.mrb[4].mxu1  ;;  %3769 = vmatprep.mubr.msk.f32.mxu1 %vm1594_vm1, %v1567_v37  ;;  %v4409_v52 = vld [vmem:[%s4814_s2] ss:$0 sm:$0xff] }
 0x1c8   : > { %v2071_v45 = vadd.f32 %v3612_v44, %v4369_v19  ;;  %v2065_v46 = vpop.f32.mrb[5].mxu1  ;;  %3770 = vmatmul.mubr.msk.f32.gmra.mrb[110].mxu1 %vm1594_vm1, %v1568_v40  ;;  %v1570_v50 = vmax.f32 %v1384_v41, 0.0 }
 0x1c9   : > { %v1569_v47 = vmax.f32 %v1379_v43, 0.0  ;;  %v2066_v48 = vadd.f32 %v4369_v19, %v2065_v46  ;;  %v3581_v49 = vpop.f32.mrb[114].mxu0 }
 0x1ca   : > { %2690 = vst.msk [vmem:[%s4377_s19 + $0x28] sm:$0xff] %vm2684_vm2, %v2071_v45  ;;  %v1394_v51 = vadd.f32 %v4409_v52, %v3581_v49  ;;  %v1388_v53 = vpop.f32.mrb[115].mxu0 }
 0x1cb   : > { %2689 = vst.msk [vmem:[%s4377_s19 + $0x20] sm:$0xff] %vm2684_vm2, %v2066_v48  ;;  %v1389_v54 = vadd.f32 %v4409_v52, %v1388_v53  ;;  %v3615_v55 = vpop.f32.mrb[6].mxu1  ;;  %3772 = vmatprep.mubr.msk.f32.mxu1 %vm1594_vm1, %v1569_v47 }
 0x1cc   : > { %v2081_v56 = vadd.f32 %v3615_v55, %v4369_v19  ;;  %v2075_v57 = vpop.f32.mrb[7].mxu1  ;;  %3773 = vmatmul.mubr.msk.f32.gmra.mrb[112].mxu1 %vm1594_vm1, %v1570_v50  ;;  %v1572_v61 = vmax.f32 %v1394_v51, 0.0 }
 0x1cd   : > { %v1571_v58 = vmax.f32 %v1389_v54, 0.0  ;;  %v2076_v59 = vadd.f32 %v4369_v19, %v2075_v57  ;;  %v3584_v60 = vpop.f32.mrb[116].mxu0 }
 0x1ce   : > { %2692 = vst.msk [vmem:[%s4377_s19 + $0x38] sm:$0xff] %vm2684_vm2, %v2081_v56  ;;  %v1404_v62 = vadd.f32 %v4409_v52, %v3584_v60  ;;  %v1398_v63 = vpop.f32.mrb[117].mxu0 }
 0x1cf   : > { %2691 = vst.msk [vmem:[%s4377_s19 + $0x30] sm:$0xff] %vm2684_vm2, %v2076_v59  ;;  %v1399_v0 = vadd.f32 %v4409_v52, %v1398_v63  ;;  %v3618_v1 = vpop.f32.mrb[8].mxu1  ;;  %3775 = vmatprep.mubr.msk.f32.mxu1 %vm1594_vm1, %v1571_v58 }
 0x1d0   : > { %v2091_v2 = vadd.f32 %v3618_v1, %v4369_v19  ;;  %v2085_v3 = vpop.f32.mrb[9].mxu1  ;;  %3776 = vmatmul.mubr.msk.f32.gmra.mrb[114].mxu1 %vm1594_vm1, %v1572_v61  ;;  %v1574_v7 = vmax.f32 %v1404_v62, 0.0 }
 0x1d1   : > { %v1573_v4 = vmax.f32 %v1399_v0, 0.0  ;;  %v2086_v5 = vadd.f32 %v4369_v19, %v2085_v3  ;;  %v3587_v6 = vpop.f32.mrb[118].mxu0 }
 0x1d2   : > { %2694 = vst.msk [vmem:[%s4377_s19 + $0x48] sm:$0xff] %vm2684_vm2, %v2091_v2  ;;  %v1414_v8 = vadd.f32 %v4409_v52, %v3587_v6  ;;  %v1408_v9 = vpop.f32.mrb[119].mxu0 }
 0x1d3   : > { %2693 = vst.msk [vmem:[%s4377_s19 + $0x40] sm:$0xff] %vm2684_vm2, %v2086_v5  ;;  %v1409_v10 = vadd.f32 %v4409_v52, %v1408_v9  ;;  %v3621_v11 = vpop.f32.mrb[10].mxu1  ;;  %3778 = vmatprep.mubr.msk.f32.mxu1 %vm1594_vm1, %v1573_v4 }
 0x1d4   : > { %v2101_v12 = vadd.f32 %v3621_v11, %v4369_v19  ;;  %v2095_v13 = vpop.f32.mrb[11].mxu1  ;;  %3779 = vmatmul.mubr.msk.f32.gmra.mrb[116].mxu1 %vm1594_vm1, %v1574_v7  ;;  %v1576_v17 = vmax.f32 %v1414_v8, 0.0 }
 0x1d5   : > { %v1575_v14 = vmax.f32 %v1409_v10, 0.0  ;;  %v2096_v15 = vadd.f32 %v4369_v19, %v2095_v13  ;;  %v3590_v16 = vpop.f32.mrb[120].mxu0 }
 0x1d6   : > { %2696 = vst.msk [vmem:[%s4377_s19 + $0x58] sm:$0xff] %vm2684_vm2, %v2101_v12  ;;  %v1424_v18 = vadd.f32 %v4409_v52, %v3590_v16  ;;  %v1418_v20 = vpop.f32.mrb[121].mxu0 }
 0x1d7   : > { %2695 = vst.msk [vmem:[%s4377_s19 + $0x50] sm:$0xff] %vm2684_vm2, %v2096_v15  ;;  %v1419_v21 = vadd.f32 %v4409_v52, %v1418_v20  ;;  %v3624_v22 = vpop.f32.mrb[12].mxu1  ;;  %3781 = vmatprep.mubr.msk.f32.mxu1 %vm1594_vm1, %v1575_v14 }
 0x1d8   : > { %v2111_v23 = vadd.f32 %v3624_v22, %v4369_v19  ;;  %v2105_v24 = vpop.f32.mrb[13].mxu1  ;;  %3782 = vmatmul.mubr.msk.f32.gmra.mrb[118].mxu1 %vm1594_vm1, %v1576_v17  ;;  %v1578_v28 = vmax.f32 %v1424_v18, 0.0 }
 0x1d9   : > { %v1577_v25 = vmax.f32 %v1419_v21, 0.0  ;;  %v2106_v26 = vadd.f32 %v4369_v19, %v2105_v24  ;;  %v3593_v27 = vpop.f32.mrb[122].mxu0 }
 0x1da   : > { %2698 = vst.msk [vmem:[%s4377_s19 + $0x68] sm:$0xff] %vm2684_vm2, %v2111_v23  ;;  %v1434_v29 = vadd.f32 %v4409_v52, %v3593_v27  ;;  %v1428_v30 = vpop.f32.mrb[123].mxu0 }
 0x1db   : > { %2697 = vst.msk [vmem:[%s4377_s19 + $0x60] sm:$0xff] %vm2684_vm2, %v2106_v26  ;;  %v1429_v31 = vadd.f32 %v4409_v52, %v1428_v30  ;;  %v3627_v32 = vpop.f32.mrb[14].mxu1  ;;  %3784 = vmatprep.mubr.msk.f32.mxu1 %vm1594_vm1, %v1577_v25 }
 0x1dc   : > { %v2121_v33 = vadd.f32 %v3627_v32, %v4369_v19  ;;  %v2115_v34 = vpop.f32.mrb[15].mxu1  ;;  %3785 = vmatmul.mubr.msk.f32.gmra.mrb[120].mxu1 %vm1594_vm1, %v1578_v28  ;;  %v1580_v38 = vmax.f32 %v1434_v29, 0.0 }
 0x1dd   : > { %v1579_v35 = vmax.f32 %v1429_v31, 0.0  ;;  %v2116_v36 = vadd.f32 %v4369_v19, %v2115_v34  ;;  %v3596_v37 = vpop.f32.mrb[124].mxu0 }
 0x1de   : > { %2700 = vst.msk [vmem:[%s4377_s19 + $0x78] sm:$0xff] %vm2684_vm2, %v2121_v33  ;;  %v1444_v39 = vadd.f32 %v4409_v52, %v3596_v37  ;;  %v1438_v40 = vpop.f32.mrb[125].mxu0 }
 0x1df   : > { %2699 = vst.msk [vmem:[%s4377_s19 + $0x70] sm:$0xff] %vm2684_vm2, %v2116_v36  ;;  %v1439_v41 = vadd.f32 %v4409_v52, %v1438_v40  ;;  %v3630_v42 = vpop.f32.mrb[16].mxu1  ;;  %3787 = vmatprep.mubr.msk.f32.mxu1 %vm1594_vm1, %v1579_v35 }
 0x1e0   : > { %v2131_v43 = vadd.f32 %v3630_v42, %v4369_v19  ;;  %v2125_v44 = vpop.f32.mrb[17].mxu1  ;;  %3788 = vmatmul.mubr.msk.f32.gmra.mrb[122].mxu1 %vm1594_vm1, %v1580_v38  ;;  %v1582_v48 = vmax.f32 %v1444_v39, 0.0 }
 0x1e1   : > { %v1581_v45 = vmax.f32 %v1439_v41, 0.0  ;;  %v2126_v46 = vadd.f32 %v4369_v19, %v2125_v44  ;;  %v3599_v47 = vpop.f32.mrb[126].mxu0 }
 0x1e2   : > { %2702 = vst.msk [vmem:[%s4377_s19 + $0x88] sm:$0xff] %vm2684_vm2, %v2131_v43  ;;  %v1454_v49 = vadd.f32 %v4409_v52, %v3599_v47  ;;  %v1448_v50 = vpop.f32.mrb[127].mxu0 }
 0x1e3   : > { %2701 = vst.msk [vmem:[%s4377_s19 + $0x80] sm:$0xff] %vm2684_vm2, %v2126_v46  ;;  %v1449_v51 = vadd.f32 %v4409_v52, %v1448_v50  ;;  %v3633_v53 = vpop.f32.mrb[18].mxu1  ;;  %3790 = vmatprep.mubr.msk.f32.mxu1 %vm1594_vm1, %v1581_v45 }
 0x1e4   : > { %v2141_v54 = vadd.f32 %v3633_v53, %v4369_v19  ;;  %v2135_v55 = vpop.f32.mrb[19].mxu1  ;;  %3791 = vmatmul.mubr.msk.f32.gmra.mrb[124].mxu1 %vm1594_vm1, %v1582_v48  ;;  %v1584_v58 = vmax.f32 %v1454_v49, 0.0 }
 0x1e5   : > { %v1583_v56 = vmax.f32 %v1449_v51, 0.0  ;;  %v2136_v57 = vadd.f32 %v4369_v19, %v2135_v55 }
 0x1e6   : > { %2704 = vst.msk [vmem:[%s4377_s19 + $0x98] sm:$0xff] %vm2684_vm2, %v2141_v54 }
 0x1e7   : > { %2703 = vst.msk [vmem:[%s4377_s19 + $0x90] sm:$0xff] %vm2684_vm2, %v2136_v57  ;;  %v3636_v52 = vpop.f32.mrb[20].mxu1  ;;  %3793 = vmatprep.mubr.msk.f32.mxu1 %vm1594_vm1, %v1583_v56 }
 0x1e8   : > { %v2151_v59 = vadd.f32 %v3636_v52, %v4369_v19  ;;  %v2145_v60 = vpop.f32.mrb[21].mxu1  ;;  %3794 = vmatmul.mubr.msk.f32.gmra.mrb[126].mxu1 %vm1594_vm1, %v1584_v58 }
 0x1e9   : > { %v2146_v61 = vadd.f32 %v4369_v19, %v2145_v60 }
 0x1ea   : > { %2706 = vst.msk [vmem:[%s4377_s19 + $0xa8] sm:$0xff] %vm2684_vm2, %v2151_v59 }
 0x1eb   : > { %2705 = vst.msk [vmem:[%s4377_s19 + $0xa0] sm:$0xff] %vm2684_vm2, %v2146_v61  ;;  %v3639_v62 = vpop.f32.mrb[22].mxu1 }
 0x1ec   : > { %v2161_v63 = vadd.f32 %v3639_v62, %v4369_v19  ;;  %v2155_v0 = vpop.f32.mrb[23].mxu1 }
 0x1ed   : > { %v2156_v1 = vadd.f32 %v4369_v19, %v2155_v0 }
 0x1ee   : > { %2708 = vst.msk [vmem:[%s4377_s19 + $0xb8] sm:$0xff] %vm2684_vm2, %v2161_v63 }
 0x1ef   : > { %2707 = vst.msk [vmem:[%s4377_s19 + $0xb0] sm:$0xff] %vm2684_vm2, %v2156_v1  ;;  %v3642_v2 = vpop.f32.mrb[24].mxu1 }
 0x1f0   : > { %v2171_v3 = vadd.f32 %v3642_v2, %v4369_v19  ;;  %v2165_v4 = vpop.f32.mrb[25].mxu1 }
 0x1f1   : > { %v2166_v5 = vadd.f32 %v4369_v19, %v2165_v4 }
 0x1f2   : > { %2710 = vst.msk [vmem:[%s4377_s19 + $0xc8] sm:$0xff] %vm2684_vm2, %v2171_v3 }
 0x1f3   : > { %2709 = vst.msk [vmem:[%s4377_s19 + $0xc0] sm:$0xff] %vm2684_vm2, %v2166_v5  ;;  %v3645_v6 = vpop.f32.mrb[26].mxu1 }
 0x1f4   : > { %v2181_v7 = vadd.f32 %v3645_v6, %v4369_v19  ;;  %v2175_v8 = vpop.f32.mrb[27].mxu1 }
 0x1f5   : > { %v2176_v9 = vadd.f32 %v4369_v19, %v2175_v8 }
 0x1f6   : > { %2712 = vst.msk [vmem:[%s4377_s19 + $0xd8] sm:$0xff] %vm2684_vm2, %v2181_v7 }
 0x1f7   : > { %2711 = vst.msk [vmem:[%s4377_s19 + $0xd0] sm:$0xff] %vm2684_vm2, %v2176_v9  ;;  %v3648_v10 = vpop.f32.mrb[28].mxu1 }
 0x1f8   : > { %v2191_v11 = vadd.f32 %v3648_v10, %v4369_v19  ;;  %v2185_v12 = vpop.f32.mrb[29].mxu1 }
 0x1f9   : > { %v2186_v13 = vadd.f32 %v4369_v19, %v2185_v12 }
 0x1fa   : > { %2714 = vst.msk [vmem:[%s4377_s19 + $0xe8] sm:$0xff] %vm2684_vm2, %v2191_v11 }
 0x1fb   : > { %2713 = vst.msk [vmem:[%s4377_s19 + $0xe0] sm:$0xff] %vm2684_vm2, %v2186_v13  ;;  %v3651_v14 = vpop.f32.mrb[30].mxu1 }
 0x1fc   : > { %v2201_v15 = vadd.f32 %v3651_v14, %v4369_v19  ;;  %v2195_v16 = vpop.f32.mrb[31].mxu1 }
 0x1fd   : > { %v2196_v17 = vadd.f32 %v4369_v19, %v2195_v16 }
 0x1fe   : > { %2716 = vst.msk [vmem:[%s4377_s19 + $0xf8] sm:$0xff] %vm2684_vm2, %v2201_v15 }
 0x1ff   : > { %2715 = vst.msk [vmem:[%s4377_s19 + $0xf0] sm:$0xff] %vm2684_vm2, %v2196_v17  ;;  %v3654_v18 = vpop.f32.mrb[32].mxu1 }
 0x200   : > { %v2211_v20 = vadd.f32 %v3654_v18, %v4369_v19  ;;  %v2205_v21 = vpop.f32.mrb[33].mxu1 }
 0x201   : > { %v2206_v22 = vadd.f32 %v4369_v19, %v2205_v21 }
 0x202   : > { %2718 = vst.msk [vmem:[%s4377_s19 + $0x108] sm:$0xff] %vm2684_vm2, %v2211_v20 }
 0x203   : > { %2717 = vst.msk [vmem:[%s4377_s19 + $0x100] sm:$0xff] %vm2684_vm2, %v2206_v22  ;;  %v3657_v23 = vpop.f32.mrb[34].mxu1 }
 0x204   : > { %v2221_v24 = vadd.f32 %v3657_v23, %v4369_v19  ;;  %v2215_v25 = vpop.f32.mrb[35].mxu1 }
 0x205   : > { %v2216_v26 = vadd.f32 %v4369_v19, %v2215_v25 }
 0x206   : > { %2720 = vst.msk [vmem:[%s4377_s19 + $0x118] sm:$0xff] %vm2684_vm2, %v2221_v24 }
 0x207   : > { %2719 = vst.msk [vmem:[%s4377_s19 + $0x110] sm:$0xff] %vm2684_vm2, %v2216_v26  ;;  %v3660_v27 = vpop.f32.mrb[36].mxu1 }
 0x208   : > { %v2231_v28 = vadd.f32 %v3660_v27, %v4369_v19  ;;  %v2225_v29 = vpop.f32.mrb[37].mxu1 }
 0x209   : > { %v2226_v30 = vadd.f32 %v4369_v19, %v2225_v29 }
 0x20a   : > { %2722 = vst.msk [vmem:[%s4377_s19 + $0x128] sm:$0xff] %vm2684_vm2, %v2231_v28 }
 0x20b   : > { %2721 = vst.msk [vmem:[%s4377_s19 + $0x120] sm:$0xff] %vm2684_vm2, %v2226_v30  ;;  %v3663_v31 = vpop.f32.mrb[38].mxu1 }
 0x20c   : > { %v2241_v32 = vadd.f32 %v3663_v31, %v4369_v19  ;;  %v2235_v33 = vpop.f32.mrb[39].mxu1 }
 0x20d   : > { %v2236_v34 = vadd.f32 %v4369_v19, %v2235_v33 }
 0x20e   : > { %2724 = vst.msk [vmem:[%s4377_s19 + $0x138] sm:$0xff] %vm2684_vm2, %v2241_v32 }
 0x20f   : > { %2723 = vst.msk [vmem:[%s4377_s19 + $0x130] sm:$0xff] %vm2684_vm2, %v2236_v34  ;;  %v3666_v35 = vpop.f32.mrb[40].mxu1 }
 0x210   : > { %v2251_v36 = vadd.f32 %v3666_v35, %v4369_v19  ;;  %v2245_v37 = vpop.f32.mrb[41].mxu1 }
 0x211   : > { %v2246_v38 = vadd.f32 %v4369_v19, %v2245_v37 }
 0x212   : > { %2726 = vst.msk [vmem:[%s4377_s19 + $0x148] sm:$0xff] %vm2684_vm2, %v2251_v36 }
 0x213   : > { %2725 = vst.msk [vmem:[%s4377_s19 + $0x140] sm:$0xff] %vm2684_vm2, %v2246_v38  ;;  %v3669_v39 = vpop.f32.mrb[42].mxu1 }
 0x214   : > { %v2261_v40 = vadd.f32 %v3669_v39, %v4369_v19  ;;  %v2255_v41 = vpop.f32.mrb[43].mxu1 }
 0x215   : > { %v2256_v42 = vadd.f32 %v4369_v19, %v2255_v41 }
 0x216   : > { %2728 = vst.msk [vmem:[%s4377_s19 + $0x158] sm:$0xff] %vm2684_vm2, %v2261_v40 }
 0x217   : > { %2727 = vst.msk [vmem:[%s4377_s19 + $0x150] sm:$0xff] %vm2684_vm2, %v2256_v42  ;;  %v3672_v43 = vpop.f32.mrb[44].mxu1 }
 0x218   : > { %v2271_v44 = vadd.f32 %v3672_v43, %v4369_v19  ;;  %v2265_v45 = vpop.f32.mrb[45].mxu1 }
 0x219   : > { %v2266_v46 = vadd.f32 %v4369_v19, %v2265_v45 }
 0x21a   : > { %2730 = vst.msk [vmem:[%s4377_s19 + $0x168] sm:$0xff] %vm2684_vm2, %v2271_v44 }
 0x21b   : > { %2729 = vst.msk [vmem:[%s4377_s19 + $0x160] sm:$0xff] %vm2684_vm2, %v2266_v46  ;;  %v3675_v47 = vpop.f32.mrb[46].mxu1 }
 0x21c   : > { %v2281_v48 = vadd.f32 %v3675_v47, %v4369_v19  ;;  %v2275_v49 = vpop.f32.mrb[47].mxu1 }
 0x21d   : > { %v2276_v50 = vadd.f32 %v4369_v19, %v2275_v49 }
 0x21e   : > { %2732 = vst.msk [vmem:[%s4377_s19 + $0x178] sm:$0xff] %vm2684_vm2, %v2281_v48 }
 0x21f   : > { %2731 = vst.msk [vmem:[%s4377_s19 + $0x170] sm:$0xff] %vm2684_vm2, %v2276_v50  ;;  %v3678_v51 = vpop.f32.mrb[48].mxu1 }
 0x220   : > { %v2291_v53 = vadd.f32 %v3678_v51, %v4369_v19  ;;  %v2285_v54 = vpop.f32.mrb[49].mxu1 }
 0x221   : > { %v2286_v55 = vadd.f32 %v4369_v19, %v2285_v54 }
 0x222   : > { %2734 = vst.msk [vmem:[%s4377_s19 + $0x188] sm:$0xff] %vm2684_vm2, %v2291_v53 }
 0x223   : > { %2733 = vst.msk [vmem:[%s4377_s19 + $0x180] sm:$0xff] %vm2684_vm2, %v2286_v55  ;;  %v3681_v56 = vpop.f32.mrb[50].mxu1 }
 0x224   : > { %v2301_v57 = vadd.f32 %v3681_v56, %v4369_v19  ;;  %v2295_v58 = vpop.f32.mrb[51].mxu1 }
 0x225   : > { %v2296_v52 = vadd.f32 %v4369_v19, %v2295_v58 }
 0x226   : > { %2736 = vst.msk [vmem:[%s4377_s19 + $0x198] sm:$0xff] %vm2684_vm2, %v2301_v57 }
 0x227   : > { %2735 = vst.msk [vmem:[%s4377_s19 + $0x190] sm:$0xff] %vm2684_vm2, %v2296_v52  ;;  %v3684_v59 = vpop.f32.mrb[52].mxu1 }
 0x228   : > { %v2311_v60 = vadd.f32 %v3684_v59, %v4369_v19  ;;  %v2305_v61 = vpop.f32.mrb[53].mxu1 }
 0x229   : > { %v2306_v62 = vadd.f32 %v4369_v19, %v2305_v61 }
 0x22a   : > { %2738 = vst.msk [vmem:[%s4377_s19 + $0x1a8] sm:$0xff] %vm2684_vm2, %v2311_v60 }
 0x22b   : > { %2737 = vst.msk [vmem:[%s4377_s19 + $0x1a0] sm:$0xff] %vm2684_vm2, %v2306_v62  ;;  %v3687_v63 = vpop.f32.mrb[54].mxu1 }
 0x22c   : > { %v2321_v0 = vadd.f32 %v3687_v63, %v4369_v19  ;;  %v2315_v1 = vpop.f32.mrb[55].mxu1 }
 0x22d   : > { %v2316_v2 = vadd.f32 %v4369_v19, %v2315_v1 }
 0x22e   : > { %2740 = vst.msk [vmem:[%s4377_s19 + $0x1b8] sm:$0xff] %vm2684_vm2, %v2321_v0 }
 0x22f   : > { %2739 = vst.msk [vmem:[%s4377_s19 + $0x1b0] sm:$0xff] %vm2684_vm2, %v2316_v2  ;;  %v3690_v3 = vpop.f32.mrb[56].mxu1 }
 0x230   : > { %v2331_v4 = vadd.f32 %v3690_v3, %v4369_v19  ;;  %v2325_v5 = vpop.f32.mrb[57].mxu1 }
 0x231   : > { %v2326_v6 = vadd.f32 %v4369_v19, %v2325_v5 }
 0x232   : > { %2742 = vst.msk [vmem:[%s4377_s19 + $0x1c8] sm:$0xff] %vm2684_vm2, %v2331_v4 }
 0x233   : > { %2741 = vst.msk [vmem:[%s4377_s19 + $0x1c0] sm:$0xff] %vm2684_vm2, %v2326_v6  ;;  %v3693_v7 = vpop.f32.mrb[58].mxu1 }
 0x234   : > { %v2341_v8 = vadd.f32 %v3693_v7, %v4369_v19  ;;  %v2335_v9 = vpop.f32.mrb[59].mxu1 }
 0x235   : > { %v2336_v10 = vadd.f32 %v4369_v19, %v2335_v9 }
 0x236   : > { %2744 = vst.msk [vmem:[%s4377_s19 + $0x1d8] sm:$0xff] %vm2684_vm2, %v2341_v8 }
 0x237   : > { %2743 = vst.msk [vmem:[%s4377_s19 + $0x1d0] sm:$0xff] %vm2684_vm2, %v2336_v10  ;;  %v3696_v11 = vpop.f32.mrb[60].mxu1 }
 0x238   : > { %v2351_v12 = vadd.f32 %v3696_v11, %v4369_v19  ;;  %v2345_v13 = vpop.f32.mrb[61].mxu1 }
 0x239   : > { %v2346_v14 = vadd.f32 %v4369_v19, %v2345_v13 }
 0x23a   : > { %2746 = vst.msk [vmem:[%s4377_s19 + $0x1e8] sm:$0xff] %vm2684_vm2, %v2351_v12 }
 0x23b   : > { %2745 = vst.msk [vmem:[%s4377_s19 + $0x1e0] sm:$0xff] %vm2684_vm2, %v2346_v14  ;;  %v3699_v15 = vpop.f32.mrb[62].mxu1 }
 0x23c   : > { %v2361_v16 = vadd.f32 %v3699_v15, %v4369_v19  ;;  %v2355_v17 = vpop.f32.mrb[63].mxu1 }
 0x23d   : > { %v2356_v18 = vadd.f32 %v4369_v19, %v2355_v17 }
 0x23e   : > { %2748 = vst.msk [vmem:[%s4377_s19 + $0x1f8] sm:$0xff] %vm2684_vm2, %v2361_v16 }
 0x23f   : > { %2747 = vst.msk [vmem:[%s4377_s19 + $0x1f0] sm:$0xff] %vm2684_vm2, %v2356_v18  ;;  %v3702_v20 = vpop.f32.mrb[64].mxu1 }
 0x240   : > { %v2371_v21 = vadd.f32 %v3702_v20, %v4369_v19  ;;  %v2365_v22 = vpop.f32.mrb[65].mxu1 }
 0x241   : > { %v2366_v23 = vadd.f32 %v4369_v19, %v2365_v22 }
 0x242   : > { %2750 = vst.msk [vmem:[%s4377_s19 + $0x208] sm:$0xff] %vm2684_vm2, %v2371_v21 }
 0x243   : > { %2749 = vst.msk [vmem:[%s4377_s19 + $0x200] sm:$0xff] %vm2684_vm2, %v2366_v23  ;;  %v3705_v24 = vpop.f32.mrb[66].mxu1 }
 0x244   : > { %v2381_v25 = vadd.f32 %v3705_v24, %v4369_v19  ;;  %v2375_v26 = vpop.f32.mrb[67].mxu1 }
 0x245   : > { %v2376_v27 = vadd.f32 %v4369_v19, %v2375_v26 }
 0x246   : > { %2752 = vst.msk [vmem:[%s4377_s19 + $0x218] sm:$0xff] %vm2684_vm2, %v2381_v25 }
 0x247   : > { %2751 = vst.msk [vmem:[%s4377_s19 + $0x210] sm:$0xff] %vm2684_vm2, %v2376_v27  ;;  %v3708_v28 = vpop.f32.mrb[68].mxu1 }
 0x248   : > { %v2391_v29 = vadd.f32 %v3708_v28, %v4369_v19  ;;  %v2385_v30 = vpop.f32.mrb[69].mxu1 }
 0x249   : > { %v2386_v31 = vadd.f32 %v4369_v19, %v2385_v30 }
 0x24a   : > { %2754 = vst.msk [vmem:[%s4377_s19 + $0x228] sm:$0xff] %vm2684_vm2, %v2391_v29 }
 0x24b   : > { %2753 = vst.msk [vmem:[%s4377_s19 + $0x220] sm:$0xff] %vm2684_vm2, %v2386_v31  ;;  %v3711_v32 = vpop.f32.mrb[70].mxu1 }
 0x24c   : > { %v2401_v33 = vadd.f32 %v3711_v32, %v4369_v19  ;;  %v2395_v34 = vpop.f32.mrb[71].mxu1 }
 0x24d   : > { %v2396_v35 = vadd.f32 %v4369_v19, %v2395_v34 }
 0x24e   : > { %2756 = vst.msk [vmem:[%s4377_s19 + $0x238] sm:$0xff] %vm2684_vm2, %v2401_v33 }
 0x24f   : > { %2755 = vst.msk [vmem:[%s4377_s19 + $0x230] sm:$0xff] %vm2684_vm2, %v2396_v35  ;;  %v3714_v36 = vpop.f32.mrb[72].mxu1 }
 0x250   : > { %v2411_v37 = vadd.f32 %v3714_v36, %v4369_v19  ;;  %v2405_v38 = vpop.f32.mrb[73].mxu1 }
 0x251   : > { %v2406_v39 = vadd.f32 %v4369_v19, %v2405_v38 }
 0x252   : > { %2758 = vst.msk [vmem:[%s4377_s19 + $0x248] sm:$0xff] %vm2684_vm2, %v2411_v37 }
 0x253   : > { %2757 = vst.msk [vmem:[%s4377_s19 + $0x240] sm:$0xff] %vm2684_vm2, %v2406_v39  ;;  %v3717_v40 = vpop.f32.mrb[74].mxu1 }
 0x254   : > { %v2421_v41 = vadd.f32 %v3717_v40, %v4369_v19  ;;  %v2415_v42 = vpop.f32.mrb[75].mxu1 }
 0x255   : > { %v2416_v43 = vadd.f32 %v4369_v19, %v2415_v42 }
 0x256   : > { %2760 = vst.msk [vmem:[%s4377_s19 + $0x258] sm:$0xff] %vm2684_vm2, %v2421_v41 }
 0x257   : > { %2759 = vst.msk [vmem:[%s4377_s19 + $0x250] sm:$0xff] %vm2684_vm2, %v2416_v43  ;;  %v3720_v44 = vpop.f32.mrb[76].mxu1 }
 0x258   : > { %v2431_v45 = vadd.f32 %v3720_v44, %v4369_v19  ;;  %v2425_v46 = vpop.f32.mrb[77].mxu1 }
 0x259   : > { %v2426_v47 = vadd.f32 %v4369_v19, %v2425_v46 }
 0x25a   : > { %2762 = vst.msk [vmem:[%s4377_s19 + $0x268] sm:$0xff] %vm2684_vm2, %v2431_v45 }
 0x25b   : > { %2761 = vst.msk [vmem:[%s4377_s19 + $0x260] sm:$0xff] %vm2684_vm2, %v2426_v47  ;;  %v3723_v48 = vpop.f32.mrb[78].mxu1 }
 0x25c   : > { %v2441_v49 = vadd.f32 %v3723_v48, %v4369_v19  ;;  %v2435_v50 = vpop.f32.mrb[79].mxu1 }
 0x25d   : > { %v2436_v51 = vadd.f32 %v4369_v19, %v2435_v50 }
 0x25e   : > { %2764 = vst.msk [vmem:[%s4377_s19 + $0x278] sm:$0xff] %vm2684_vm2, %v2441_v49 }
 0x25f   : > { %2763 = vst.msk [vmem:[%s4377_s19 + $0x270] sm:$0xff] %vm2684_vm2, %v2436_v51  ;;  %v3726_v53 = vpop.f32.mrb[80].mxu1 }
 0x260   : > { %v2451_v54 = vadd.f32 %v3726_v53, %v4369_v19  ;;  %v2445_v55 = vpop.f32.mrb[81].mxu1 }
 0x261   : > { %v2446_v56 = vadd.f32 %v4369_v19, %v2445_v55 }
 0x262   : > { %2766 = vst.msk [vmem:[%s4377_s19 + $0x288] sm:$0xff] %vm2684_vm2, %v2451_v54 }
 0x263   : > { %2765 = vst.msk [vmem:[%s4377_s19 + $0x280] sm:$0xff] %vm2684_vm2, %v2446_v56  ;;  %v3729_v57 = vpop.f32.mrb[82].mxu1 }
 0x264   : > { %v2461_v58 = vadd.f32 %v3729_v57, %v4369_v19  ;;  %v2455_v52 = vpop.f32.mrb[83].mxu1 }
 0x265   : > { %v2456_v59 = vadd.f32 %v4369_v19, %v2455_v52 }
 0x266   : > { %2768 = vst.msk [vmem:[%s4377_s19 + $0x298] sm:$0xff] %vm2684_vm2, %v2461_v58 }
 0x267   : > { %2767 = vst.msk [vmem:[%s4377_s19 + $0x290] sm:$0xff] %vm2684_vm2, %v2456_v59  ;;  %v3732_v60 = vpop.f32.mrb[84].mxu1 }
 0x268   : > { %v2471_v61 = vadd.f32 %v3732_v60, %v4369_v19  ;;  %v2465_v62 = vpop.f32.mrb[85].mxu1 }
 0x269   : > { %v2466_v63 = vadd.f32 %v4369_v19, %v2465_v62 }
 0x26a   : > { %2770 = vst.msk [vmem:[%s4377_s19 + $0x2a8] sm:$0xff] %vm2684_vm2, %v2471_v61 }
 0x26b   : > { %2769 = vst.msk [vmem:[%s4377_s19 + $0x2a0] sm:$0xff] %vm2684_vm2, %v2466_v63  ;;  %v3735_v0 = vpop.f32.mrb[86].mxu1 }
 0x26c   : > { %v2481_v1 = vadd.f32 %v3735_v0, %v4369_v19  ;;  %v2475_v2 = vpop.f32.mrb[87].mxu1 }
 0x26d   : > { %v2476_v3 = vadd.f32 %v4369_v19, %v2475_v2 }
 0x26e   : > { %2772 = vst.msk [vmem:[%s4377_s19 + $0x2b8] sm:$0xff] %vm2684_vm2, %v2481_v1 }
 0x26f   : > { %2771 = vst.msk [vmem:[%s4377_s19 + $0x2b0] sm:$0xff] %vm2684_vm2, %v2476_v3  ;;  %v3738_v4 = vpop.f32.mrb[88].mxu1 }
 0x270   : > { %v2491_v5 = vadd.f32 %v3738_v4, %v4369_v19  ;;  %v2485_v6 = vpop.f32.mrb[89].mxu1 }
 0x271   : > { %v2486_v7 = vadd.f32 %v4369_v19, %v2485_v6 }
 0x272   : > { %2774 = vst.msk [vmem:[%s4377_s19 + $0x2c8] sm:$0xff] %vm2684_vm2, %v2491_v5 }
 0x273   : > { %2773 = vst.msk [vmem:[%s4377_s19 + $0x2c0] sm:$0xff] %vm2684_vm2, %v2486_v7  ;;  %v3741_v8 = vpop.f32.mrb[90].mxu1 }
 0x274   : > { %v2501_v9 = vadd.f32 %v3741_v8, %v4369_v19  ;;  %v2495_v10 = vpop.f32.mrb[91].mxu1 }
 0x275   : > { %v2496_v11 = vadd.f32 %v4369_v19, %v2495_v10 }
 0x276   : > { %2776 = vst.msk [vmem:[%s4377_s19 + $0x2d8] sm:$0xff] %vm2684_vm2, %v2501_v9 }
 0x277   : > { %2775 = vst.msk [vmem:[%s4377_s19 + $0x2d0] sm:$0xff] %vm2684_vm2, %v2496_v11  ;;  %v3744_v12 = vpop.f32.mrb[92].mxu1 }
 0x278   : > { %v2511_v13 = vadd.f32 %v3744_v12, %v4369_v19  ;;  %v2505_v14 = vpop.f32.mrb[93].mxu1 }
 0x279   : > { %v2506_v15 = vadd.f32 %v4369_v19, %v2505_v14 }
 0x27a   : > { %2778 = vst.msk [vmem:[%s4377_s19 + $0x2e8] sm:$0xff] %vm2684_vm2, %v2511_v13 }
 0x27b   : > { %2777 = vst.msk [vmem:[%s4377_s19 + $0x2e0] sm:$0xff] %vm2684_vm2, %v2506_v15  ;;  %v3747_v16 = vpop.f32.mrb[94].mxu1 }
 0x27c   : > { %v2521_v17 = vadd.f32 %v3747_v16, %v4369_v19  ;;  %v2515_v18 = vpop.f32.mrb[95].mxu1 }
 0x27d   : > { %v2516_v20 = vadd.f32 %v4369_v19, %v2515_v18 }
 0x27e   : > { %2780 = vst.msk [vmem:[%s4377_s19 + $0x2f8] sm:$0xff] %vm2684_vm2, %v2521_v17 }
 0x27f   : > { %2779 = vst.msk [vmem:[%s4377_s19 + $0x2f0] sm:$0xff] %vm2684_vm2, %v2516_v20  ;;  %v3750_v21 = vpop.f32.mrb[96].mxu1 }
 0x280   : > { %v2531_v22 = vadd.f32 %v3750_v21, %v4369_v19  ;;  %v2525_v23 = vpop.f32.mrb[97].mxu1 }
 0x281   : > { %v2526_v24 = vadd.f32 %v4369_v19, %v2525_v23 }
 0x282   : > { %2782 = vst.msk [vmem:[%s4377_s19 + $0x308] sm:$0xff] %vm2684_vm2, %v2531_v22 }
 0x283   : > { %2781 = vst.msk [vmem:[%s4377_s19 + $0x300] sm:$0xff] %vm2684_vm2, %v2526_v24  ;;  %v3753_v25 = vpop.f32.mrb[98].mxu1 }
 0x284   : > { %v2541_v26 = vadd.f32 %v3753_v25, %v4369_v19  ;;  %v2535_v27 = vpop.f32.mrb[99].mxu1 }
 0x285   : > { %v2536_v28 = vadd.f32 %v4369_v19, %v2535_v27 }
 0x286   : > { %2784 = vst.msk [vmem:[%s4377_s19 + $0x318] sm:$0xff] %vm2684_vm2, %v2541_v26 }
 0x287   : > { %2783 = vst.msk [vmem:[%s4377_s19 + $0x310] sm:$0xff] %vm2684_vm2, %v2536_v28  ;;  %v3756_v29 = vpop.f32.mrb[100].mxu1 }
 0x288   : > { %v2551_v30 = vadd.f32 %v3756_v29, %v4369_v19  ;;  %v2545_v31 = vpop.f32.mrb[101].mxu1 }
 0x289   : > { %v2546_v32 = vadd.f32 %v4369_v19, %v2545_v31 }
 0x28a   : > { %2786 = vst.msk [vmem:[%s4377_s19 + $0x328] sm:$0xff] %vm2684_vm2, %v2551_v30 }
 0x28b   : > { %2785 = vst.msk [vmem:[%s4377_s19 + $0x320] sm:$0xff] %vm2684_vm2, %v2546_v32  ;;  %v3759_v33 = vpop.f32.mrb[102].mxu1 }
 0x28c   : > { %v2561_v34 = vadd.f32 %v3759_v33, %v4369_v19  ;;  %v2555_v35 = vpop.f32.mrb[103].mxu1 }
 0x28d   : > { %v2556_v36 = vadd.f32 %v4369_v19, %v2555_v35 }
 0x28e   : > { %2788 = vst.msk [vmem:[%s4377_s19 + $0x338] sm:$0xff] %vm2684_vm2, %v2561_v34 }
 0x28f   : > { %2787 = vst.msk [vmem:[%s4377_s19 + $0x330] sm:$0xff] %vm2684_vm2, %v2556_v36  ;;  %v3762_v37 = vpop.f32.mrb[104].mxu1 }
 0x290   : > { %v2571_v38 = vadd.f32 %v3762_v37, %v4369_v19  ;;  %v2565_v39 = vpop.f32.mrb[105].mxu1 }
 0x291   : > { %v2566_v40 = vadd.f32 %v4369_v19, %v2565_v39 }
 0x292   : > { %2790 = vst.msk [vmem:[%s4377_s19 + $0x348] sm:$0xff] %vm2684_vm2, %v2571_v38 }
 0x293   : > { %2789 = vst.msk [vmem:[%s4377_s19 + $0x340] sm:$0xff] %vm2684_vm2, %v2566_v40  ;;  %v3765_v41 = vpop.f32.mrb[106].mxu1 }
 0x294   : > { %v2581_v42 = vadd.f32 %v3765_v41, %v4369_v19  ;;  %v2575_v43 = vpop.f32.mrb[107].mxu1 }
 0x295   : > { %v2576_v44 = vadd.f32 %v4369_v19, %v2575_v43 }
 0x296   : > { %2792 = vst.msk [vmem:[%s4377_s19 + $0x358] sm:$0xff] %vm2684_vm2, %v2581_v42 }
 0x297   : > { %2791 = vst.msk [vmem:[%s4377_s19 + $0x350] sm:$0xff] %vm2684_vm2, %v2576_v44  ;;  %v3768_v45 = vpop.f32.mrb[108].mxu1 }
 0x298   : > { %v2591_v46 = vadd.f32 %v3768_v45, %v4369_v19  ;;  %v2585_v47 = vpop.f32.mrb[109].mxu1 }
 0x299   : > { %v2586_v48 = vadd.f32 %v4369_v19, %v2585_v47 }
 0x29a   : > { %2794 = vst.msk [vmem:[%s4377_s19 + $0x368] sm:$0xff] %vm2684_vm2, %v2591_v46 }
 0x29b   : > { %2793 = vst.msk [vmem:[%s4377_s19 + $0x360] sm:$0xff] %vm2684_vm2, %v2586_v48  ;;  %v3771_v49 = vpop.f32.mrb[110].mxu1 }
 0x29c   : > { %v2601_v50 = vadd.f32 %v3771_v49, %v4369_v19  ;;  %v2595_v51 = vpop.f32.mrb[111].mxu1 }
 0x29d   : > { %v2596_v53 = vadd.f32 %v4369_v19, %v2595_v51 }
 0x29e   : > { %2796 = vst.msk [vmem:[%s4377_s19 + $0x378] sm:$0xff] %vm2684_vm2, %v2601_v50 }
 0x29f   : > { %2795 = vst.msk [vmem:[%s4377_s19 + $0x370] sm:$0xff] %vm2684_vm2, %v2596_v53  ;;  %v3774_v54 = vpop.f32.mrb[112].mxu1 }
 0x2a0   : > { %v2611_v55 = vadd.f32 %v3774_v54, %v4369_v19  ;;  %v2605_v56 = vpop.f32.mrb[113].mxu1 }
 0x2a1   : > { %v2606_v57 = vadd.f32 %v4369_v19, %v2605_v56 }
 0x2a2   : > { %2798 = vst.msk [vmem:[%s4377_s19 + $0x388] sm:$0xff] %vm2684_vm2, %v2611_v55 }
 0x2a3   : > { %2797 = vst.msk [vmem:[%s4377_s19 + $0x380] sm:$0xff] %vm2684_vm2, %v2606_v57  ;;  %v3777_v58 = vpop.f32.mrb[114].mxu1 }
 0x2a4   : > { %v2621_v52 = vadd.f32 %v3777_v58, %v4369_v19  ;;  %v2615_v59 = vpop.f32.mrb[115].mxu1 }
 0x2a5   : > { %v2616_v60 = vadd.f32 %v4369_v19, %v2615_v59 }
 0x2a6   : > { %2800 = vst.msk [vmem:[%s4377_s19 + $0x398] sm:$0xff] %vm2684_vm2, %v2621_v52 }
 0x2a7   : > { %2799 = vst.msk [vmem:[%s4377_s19 + $0x390] sm:$0xff] %vm2684_vm2, %v2616_v60  ;;  %v3780_v61 = vpop.f32.mrb[116].mxu1 }
 0x2a8   : > { %v2631_v62 = vadd.f32 %v3780_v61, %v4369_v19  ;;  %v2625_v63 = vpop.f32.mrb[117].mxu1 }
 0x2a9   : > { %v2626_v0 = vadd.f32 %v4369_v19, %v2625_v63 }
 0x2aa   : > { %2802 = vst.msk [vmem:[%s4377_s19 + $0x3a8] sm:$0xff] %vm2684_vm2, %v2631_v62 }
 0x2ab   : > { %2801 = vst.msk [vmem:[%s4377_s19 + $0x3a0] sm:$0xff] %vm2684_vm2, %v2626_v0  ;;  %v3783_v1 = vpop.f32.mrb[118].mxu1 }
 0x2ac   : > { %v2641_v2 = vadd.f32 %v3783_v1, %v4369_v19  ;;  %v2635_v3 = vpop.f32.mrb[119].mxu1 }
 0x2ad   : > { %v2636_v4 = vadd.f32 %v4369_v19, %v2635_v3 }
 0x2ae   : > { %2804 = vst.msk [vmem:[%s4377_s19 + $0x3b8] sm:$0xff] %vm2684_vm2, %v2641_v2 }
 0x2af   : > { %2803 = vst.msk [vmem:[%s4377_s19 + $0x3b0] sm:$0xff] %vm2684_vm2, %v2636_v4  ;;  %v3786_v5 = vpop.f32.mrb[120].mxu1 }
 0x2b0   : > { %v2651_v6 = vadd.f32 %v3786_v5, %v4369_v19  ;;  %v2645_v7 = vpop.f32.mrb[121].mxu1 }
 0x2b1   : > { %v2646_v8 = vadd.f32 %v4369_v19, %v2645_v7 }
 0x2b2   : > { %2806 = vst.msk [vmem:[%s4377_s19 + $0x3c8] sm:$0xff] %vm2684_vm2, %v2651_v6 }
 0x2b3   : > { %2805 = vst.msk [vmem:[%s4377_s19 + $0x3c0] sm:$0xff] %vm2684_vm2, %v2646_v8  ;;  %v3789_v9 = vpop.f32.mrb[122].mxu1 }
 0x2b4   : > { %v2661_v10 = vadd.f32 %v3789_v9, %v4369_v19  ;;  %v2655_v11 = vpop.f32.mrb[123].mxu1 }
 0x2b5   : > { %v2656_v12 = vadd.f32 %v4369_v19, %v2655_v11 }
 0x2b6   : > { %2808 = vst.msk [vmem:[%s4377_s19 + $0x3d8] sm:$0xff] %vm2684_vm2, %v2661_v10 }
 0x2b7   : > { %2807 = vst.msk [vmem:[%s4377_s19 + $0x3d0] sm:$0xff] %vm2684_vm2, %v2656_v12  ;;  %v3792_v13 = vpop.f32.mrb[124].mxu1 }
 0x2b8   : > { %v2671_v14 = vadd.f32 %v3792_v13, %v4369_v19  ;;  %v2665_v15 = vpop.f32.mrb[125].mxu1 }
 0x2b9   : > { %v2666_v16 = vadd.f32 %v4369_v19, %v2665_v15 }
 0x2ba   : > { %2810 = vst.msk [vmem:[%s4377_s19 + $0x3e8] sm:$0xff] %vm2684_vm2, %v2671_v14 }
 0x2bb   : > { %2809 = vst.msk [vmem:[%s4377_s19 + $0x3e0] sm:$0xff] %vm2684_vm2, %v2666_v16  ;;  %v3795_v17 = vpop.f32.mrb[126].mxu1 }
 0x2bc   : > { %v2681_v18 = vadd.f32 %v3795_v17, %v4369_v19  ;;  %v2675_v20 = vpop.f32.mrb[127].mxu1 }
 0x2bd   : > { %v2676_v21 = vadd.f32 %v4369_v19, %v2675_v20 }
 0x2be   : > { %2812 = vst.msk [vmem:[%s4377_s19 + $0x3f8] sm:$0xff] %vm2684_vm2, %v2681_v18 }
 0x2bf   : > { %2811 = vst.msk [vmem:[%s4377_s19 + $0x3f0] sm:$0xff] %vm2684_vm2, %v2676_v21 }
 0x2c0 PF: > { %s15_s18 = sadd.s32 1, %s3823_s18  }
 0x2c1   : > { %p12_p4 = scmp.ge.s32.totalorder %s15_s18, 4  }
 0x2c3   :  { %14 = sbr.rel (!%p12_p4) target bundleno = 1 (0x1), region = 70 }

</bundles_post_ra>
